<compile_context>
chip_gen: v7x
topology: tpu7x:2x2x1
jax: 0.10.0
libtpu: 0.0.40
codegen_flags: <defaults>
</compile_context>

<pallas_src>
import functools

import jax
import jax.numpy as jnp
from jax.experimental import pallas as pl
from jax.experimental.pallas import tpu as pltpu


def _cross_attn_kernel(x_ref, c_ref, bias_ref,
                       wq_ref, bq_ref, wk_ref, bk_ref, wv_ref, bv_ref,
                       wp_ref, bp_ref, o_ref, ctx_ref, *, num_heads):
    f32 = jnp.float32
    bf16 = jnp.bfloat16

    bt = bias_ref.shape[0]                 # batch elements in this grid step
    rows_q, C = o_ref.shape                # (bt*N, C)
    N = rows_q // bt
    L = c_ref.shape[0] // bt
    H = num_heads
    D = C // H

    # Cast activations in-kernel (VPU has slack; halves activation HBM traffic
    # vs a separate wrapper-side cast pass).
    xb = x_ref[...].astype(bf16)           # (bt*N, C)
    cb = c_ref[...].astype(bf16)           # (bt*L, C)

    # Full-width projections: (rows, C) @ (C, C), bf16 operands, f32 MXU acc.
    # The attention scale is already folded into wq / bq.  Bias add is fused
    # into the single bf16 cast so no f32 copy stays live.
    q = (jnp.dot(xb, wq_ref[...], preferred_element_type=f32) + bq_ref[...]).astype(bf16)
    k = (jnp.dot(cb, wk_ref[...], preferred_element_type=f32) + bk_ref[...]).astype(bf16)
    v = (jnp.dot(cb, wv_ref[...], preferred_element_type=f32) + bv_ref[...]).astype(bf16)

    q3 = q.reshape(bt, N, C)
    k3 = k.reshape(bt, L, C)
    v3 = v.reshape(bt, L, C)

    bias = bias_ref[...]                    # (bt, 1, L) additive f32, 0 / -1e30

    # Per-head attention -- the only inherently head_dim-wide work.
    for h in range(H):
        sl = slice(h * D, (h + 1) * D)
        s = jnp.einsum('bnd,bld->bnl', q3[:, :, sl], k3[:, :, sl],
                       preferred_element_type=f32)               # (bt, N, L)
        s = s + bias
        s_max = jnp.max(s, axis=-1, keepdims=True)
        p = jnp.exp(s - s_max)                                    # f32 (v5e: no bf16 EUP)
        denom = jnp.sum(p, axis=-1, keepdims=True)                # (bt, N, 1)
        o_h = jnp.einsum('bnl,bld->bnd', p.astype(bf16), v3[:, :, sl],
                         preferred_element_type=f32)              # (bt, N, D)
        # Deferred softmax normalization: scale the (N, D) context, not the
        # (N, L) probabilities.
        o_h = o_h * pl.reciprocal(denom, approx=True)
        ctx_ref[:, sl] = o_h.reshape(bt * N, D).astype(ctx_ref.dtype)

    # Single full-width output projection over the reassembled heads.
    y = jnp.dot(ctx_ref[...], wp_ref[...], preferred_element_type=f32) + bp_ref[...]
    o_ref[...] = y.astype(o_ref.dtype)


def _pick_batch_block(B, N, L, C, in_bytes, out_bytes,
                      target_rows=512, vmem_budget=40 * 1024 * 1024):
    """Largest divisor of B whose tile fits the VMEM budget, stopping once the
    query-row tile reaches `target_rows` (amortizes ~0.35 us per-step overhead
    and fills MXU rows)."""
    weight_bytes = 4 * C * C * 2 * 2 + 8 * C * 4     # bf16 W (2 bufs) + f32 biases

    def tile_bytes(bt):
        rq, rc = bt * N, bt * L
        act = 2 * (rq * C * in_bytes + rc * C * in_bytes + bt * L * 4)   # dbl-buffered inputs
        outb = 2 * rq * C * out_bytes                                    # dbl-buffered output
        scratch = rq * C * 2                                             # bf16 context slab
        temps = 4 * rq * C * 4 + 2 * rc * C * 4 + 2 * rq * L * 4         # q/k/v + per-head s/p
        return weight_bytes + act + outb + scratch + temps

    best = None
    for bt in range(1, B + 1):
        if B % bt:
            continue
        # (8, 128) block-divisibility: rows must be a multiple of 8 or the
        # block must span the full row extent (bt == B).
        if bt != B and ((bt * N) % 8 != 0 or (bt * L) % 8 != 0):
            continue
        if tile_bytes(bt) > vmem_budget:
            continue
        best = bt
        if bt * N >= target_rows:
            break
    return best if best is not None else B


def cross_attention(x, c, mask, params, *, num_heads, batch_block=None):
    B, N, C = x.shape
    _, L, _ = c.shape
    assert C % num_heads == 0, "dim must be divisible by num_heads"
    H = num_heads
    D = C // H
    scale = D ** -0.5
    out_dtype = x.dtype
    in_bytes = jnp.dtype(x.dtype).itemsize
    out_bytes = jnp.dtype(out_dtype).itemsize

    wq, bq, wkv, bkv, wproj, bproj = params

    # ---- one-time parameter prep (plain XLA, outside the hot kernel) ----
    wq_b = (wq * scale).astype(jnp.bfloat16)     # fold attention scale into Wq/bq
    bq_f = (bq * scale).astype(jnp.float32)
    wk_b = wkv[:, :C].astype(jnp.bfloat16)       # split fused kv -> lane-dense K / V
    wv_b = wkv[:, C:].astype(jnp.bfloat16)
    bk_f = bkv[:, :C].astype(jnp.float32)
    bv_f = bkv[:, C:].astype(jnp.float32)
    wp_b = wproj.astype(jnp.bfloat16)
    bp_f = bproj.astype(jnp.float32)

    # Activations at native dtype (cast to bf16 inside the kernel).
    x2 = x.reshape(B * N, C)
    c2 = c.reshape(B * L, C)
    # Additive mask bias, precomputed once in f32.
    bias3 = jnp.where(mask.reshape(B, 1, L) != 0, 0.0, -1e30).astype(jnp.float32)

    # ---- per-generation VMEM budget (v7x: 64 MiB phys -> 48 MiB; v5e/v6e:
    #      128 MiB phys -> 96 MiB) ----
    try:
        vmem_phys = int(pltpu.get_tpu_info().vmem_capacity_bytes)
    except Exception:
        vmem_phys = 64 * 1024 * 1024             # conservative (v7x-sized)
    vmem_limit = max(32 * 1024 * 1024,
                     min(int(0.75 * vmem_phys), 112 * 1024 * 1024))

    # ---- batch tile: >= 512 query rows per step when possible, VMEM-bounded ----
    if batch_block is None:
        bt = _pick_batch_block(B, N, L, C, in_bytes, out_bytes,
                               vmem_budget=vmem_limit - 8 * 1024 * 1024)
    else:
        bt = batch_block
        assert B % bt == 0
    nb = B // bt

    grid_spec = pltpu.PrefetchScalarGridSpec(
        num_scalar_prefetch=0,
        grid=(nb,),
        in_specs=[
            pl.BlockSpec((bt * N, C), lambda b: (b, 0)),     # x rows
            pl.BlockSpec((bt * L, C), lambda b: (b, 0)),     # c rows
            pl.BlockSpec((bt, 1, L), lambda b: (b, 0, 0)),   # additive mask bias
            # Weights / biases: constant index_map -> DMA'd exactly once,
            # resident across all batch blocks.
            pl.BlockSpec((C, C), lambda b: (0, 0)),          # Wq (scale folded)
            pl.BlockSpec((1, C), lambda b: (0, 0)),          # bq
            pl.BlockSpec((C, C), lambda b: (0, 0)),          # Wk
            pl.BlockSpec((1, C), lambda b: (0, 0)),          # bk
            pl.BlockSpec((C, C), lambda b: (0, 0)),          # Wv
            pl.BlockSpec((1, C), lambda b: (0, 0)),          # bv
            pl.BlockSpec((C, C), lambda b: (0, 0)),          # Wproj
            pl.BlockSpec((1, C), lambda b: (0, 0)),          # bproj
        ],
        out_specs=pl.BlockSpec((bt * N, C), lambda b: (b, 0)),
        scratch_shapes=[pltpu.VMEM((bt * N, C), jnp.bfloat16)],   # per-head ctx slab
    )

    flops = int(2 * B * N * C * C            # q projection
                + 4 * B * L * C * C          # k + v projections
                + 4 * B * N * L * C          # qk^T + pv (summed over heads)
                + 2 * B * N * C * C)         # output projection
    cost = pl.CostEstimate(
        flops=flops,
        transcendentals=int(B * H * N * L),
        bytes_accessed=int(B * N * C * in_bytes + B * L * C * in_bytes
                           + B * L * 4
                           + 4 * C * C * 2 + 4 * C * 4
                           + B * N * C * out_bytes),
    )

    out2 = pl.pallas_call(
        functools.partial(_cross_attn_kernel, num_heads=H),
        out_shape=jax.ShapeDtypeStruct((B * N, C), out_dtype),
        grid_spec=grid_spec,
        compiler_params=pltpu.CompilerParams(
            # Batch axis is parallel: megacore (v7x 2 TCs) splits blocks when nb >= 2.
            dimension_semantics=("parallel",),
            vmem_limit_bytes=vmem_limit,
        ),
        cost_estimate=cost,
    )(x2, c2, bias3, wq_b, bq_f, wk_b, bk_f, wv_b, bv_f, wp_b, bp_f)

    return out2.reshape(B, N, C)


def cross_attention_ref(x, c, mask, params, *, num_heads,
                        mirror_kernel_precision=True):
    """Pure-JAX reference of the PyTorch forward (eval mode).

    mirror_kernel_precision=True mimics the kernel's bf16-in / f32-acc dots so
    the comparison isolates kernel correctness from bf16 rounding.
    """
    B, N, C = x.shape
    _, L, _ = c.shape
    H = num_heads
    D = C // H
    scale = D ** -0.5
    wq, bq, wkv, bkv, wproj, bproj = params

    if mirror_kernel_precision:
        lo = lambda a: a.astype(jnp.bfloat16)
    else:
        lo = lambda a: a.astype(jnp.float32)
    mm = lambda a, b: jnp.dot(lo(a), lo(b), preferred_element_type=jnp.float32)

    q = mm(x.reshape(B * N, C), wq * scale) + (bq * scale)[0]
    k = mm(c.reshape(B * L, C), wkv[:, :C]) + bkv[0, :C]
    v = mm(c.reshape(B * L, C), wkv[:, C:]) + bkv[0, C:]

    q = q.reshape(B, N, H, D).transpose(0, 2, 1, 3)   # (B, H, N, D)
    k = k.reshape(B, L, H, D).transpose(0, 2, 1, 3)   # (B, H, L, D)
    v = v.reshape(B, L, H, D).transpose(0, 2, 1, 3)   # (B, H, L, D)

    s = jnp.einsum('bhnd,bhld->bhnl', lo(q), lo(k),
                   preferred_element_type=jnp.float32)
    bias = jnp.where(mask.reshape(B, 1, 1, L) != 0, 0.0, -1e30).astype(jnp.float32)
    p = jax.nn.softmax(s + bias, axis=-1)
    o = jnp.einsum('bhnl,bhld->bhnd', lo(p), lo(v),
                   preferred_element_type=jnp.float32)
    o = o.transpose(0, 2, 1, 3).reshape(B * N, C)
    y = mm(o, wproj) + bproj[0]
    return y.reshape(B, N, C)


def init_params(key, dim):
    """Deterministic synthetic parameters (shapes from nn.Linear in __init__),
    stored pre-transposed as (in_features, out_features)."""
    ks = jax.random.split(key, 6)
    sd = 1.0 / (dim ** 0.5)
    wq = jax.random.uniform(ks[0], (dim, dim), jnp.float32, -sd, sd)
    bq = jax.random.uniform(ks[1], (1, dim), jnp.float32, -sd, sd)
    wkv = jax.random.uniform(ks[2], (dim, 2 * dim), jnp.float32, -sd, sd)
    bkv = jax.random.uniform(ks[3], (1, 2 * dim), jnp.float32, -sd, sd)
    wproj = jax.random.uniform(ks[4], (dim, dim), jnp.float32, -sd, sd)
    bproj = jax.random.uniform(ks[5], (1, dim), jnp.float32, -sd, sd)
    return (wq, bq, wkv, bkv, wproj, bproj)


if __name__ == "__main__":
    # Small shapes consistent with the module's forward: x (B, N, C), c (B, L, C).
    # C = 128 keeps all matmuls lane-dense; H = 8 -> head_dim 16.
    B, N, L, C, H = 2, 8, 16, 128, 8

    key = jax.random.PRNGKey(0)
    kx, kc, km, kp = jax.random.split(key, 4)

    x = jax.random.normal(kx, (B, N, C), jnp.float32)
    c = jax.random.normal(kc, (B, L, C), jnp.float32)
    # Boolean attention mask over context tokens (kernel is NaN-safe even for
    # fully-masked rows thanks to the finite -1e30 bias).
    mask = jax.random.uniform(km, (B, L)) > 0.3
    params = init_params(kp, C)

    out = cross_attention(x, c, mask, params, num_heads=H)
    out = jax.block_until_ready(out)

    assert out.shape == (B, N, C)
    assert not bool(jnp.any(jnp.isnan(out))), "NaN in kernel output"

    ref_mirror = cross_attention_ref(x, c, mask, params, num_heads=H,
                                     mirror_kernel_precision=True)
    assert jnp.allclose(out, ref_mirror, atol=1e-2, rtol=1e-2), \
        "mismatch vs bf16-matched JAX reference"

    ref_f32 = cross_attention_ref(x, c, mask, params, num_heads=H,
                                  mirror_kernel_precision=False)
    assert jnp.allclose(out, ref_f32, atol=5e-2, rtol=5e-2), \
        "mismatch vs f32 JAX reference"

    # TODO(synk): attn_drop / proj_drop are inference no-ops here; training-mode dropout not implemented.
    print("KERNEL_OK")
</pallas_src>

<mosaic_0001>
module attributes {stable_mosaic.version = 11 : i64} {
  func.func @_cross_attn_kernel(%arg0: i32, %arg1: memref<16x128xf32, #tpu.memory_space<vmem>>, %arg2: memref<32x128xf32, #tpu.memory_space<vmem>>, %arg3: memref<2x1x16xf32, #tpu.memory_space<vmem>>, %arg4: memref<128x128xbf16, #tpu.memory_space<vmem>>, %arg5: memref<1x128xf32, #tpu.memory_space<vmem>>, %arg6: memref<128x128xbf16, #tpu.memory_space<vmem>>, %arg7: memref<1x128xf32, #tpu.memory_space<vmem>>, %arg8: memref<128x128xbf16, #tpu.memory_space<vmem>>, %arg9: memref<1x128xf32, #tpu.memory_space<vmem>>, %arg10: memref<128x128xbf16, #tpu.memory_space<vmem>>, %arg11: memref<1x128xf32, #tpu.memory_space<vmem>>, %arg12: memref<16x128xf32, #tpu.memory_space<vmem>>, %arg13: memref<16x128xbf16, #tpu.memory_space<vmem>>) attributes {dimension_semantics = [#tpu.dimension_semantics<parallel>], iteration_bounds = array<i64: 1>, scalar_prefetch = 0 : i64, scratch_operands = 1 : i64, tpu.core_type = #tpu.core_type<tc>, window_params = [{transform_indices = @transform_0, window_bounds = array<i64: 16, 128>}, {transform_indices = @transform_1, window_bounds = array<i64: 32, 128>}, {transform_indices = @transform_2, window_bounds = array<i64: 2, 1, 16>}, {pipeline_mode = #tpu.pipeline_mode<synchronous>, transform_indices = @transform_3, window_bounds = array<i64: 128, 128>}, {pipeline_mode = #tpu.pipeline_mode<synchronous>, transform_indices = @transform_4, window_bounds = array<i64: 1, 128>}, {pipeline_mode = #tpu.pipeline_mode<synchronous>, transform_indices = @transform_5, window_bounds = array<i64: 128, 128>}, {pipeline_mode = #tpu.pipeline_mode<synchronous>, transform_indices = @transform_6, window_bounds = array<i64: 1, 128>}, {pipeline_mode = #tpu.pipeline_mode<synchronous>, transform_indices = @transform_7, window_bounds = array<i64: 128, 128>}, {pipeline_mode = #tpu.pipeline_mode<synchronous>, transform_indices = @transform_8, window_bounds = array<i64: 1, 128>}, {pipeline_mode = #tpu.pipeline_mode<synchronous>, transform_indices = @transform_9, window_bounds = array<i64: 128, 128>}, {pipeline_mode = #tpu.pipeline_mode<synchronous>, transform_indices = @transform_10, window_bounds = array<i64: 1, 128>}, {transform_indices = @transform_11, window_bounds = array<i64: 16, 128>}]} {
    %c0 = arith.constant 0 : index
    %c0_0 = arith.constant 0 : index
    %0 = vector.load %arg1[%c0, %c0_0] : memref<16x128xf32, #tpu.memory_space<vmem>>, vector<16x128xf32>
    %1 = arith.truncf %0 : vector<16x128xf32> to vector<16x128xbf16>
    %c0_1 = arith.constant 0 : index
    %c0_2 = arith.constant 0 : index
    %2 = vector.load %arg2[%c0_1, %c0_2] : memref<32x128xf32, #tpu.memory_space<vmem>>, vector<32x128xf32>
    %3 = arith.truncf %2 : vector<32x128xf32> to vector<32x128xbf16>
    %c0_3 = arith.constant 0 : index
    %c0_4 = arith.constant 0 : index
    %4 = vector.load %arg4[%c0_3, %c0_4] : memref<128x128xbf16, #tpu.memory_space<vmem>>, vector<128x128xbf16>
    %cst = arith.constant dense<0.000000e+00> : vector<16x128xf32>
    %5 = tpu.matmul %1, %4, %cst {dimension_numbers = #tpu.dot_dimension_numbers<[1], [0], [0], [1], [0, 0, 1, 1], [], []>} : vector<16x128xbf16>, vector<128x128xbf16>, vector<16x128xf32> -> vector<16x128xf32>
    %c0_5 = arith.constant 0 : index
    %c0_6 = arith.constant 0 : index
    %6 = vector.load %arg5[%c0_5, %c0_6] : memref<1x128xf32, #tpu.memory_space<vmem>>, vector<1x128xf32>
    %7 = vector.broadcast %6 : vector<1x128xf32> to vector<16x128xf32>
    %8 = arith.addf %5, %7 : vector<16x128xf32>
    %9 = arith.truncf %8 : vector<16x128xf32> to vector<16x128xbf16>
    %c0_7 = arith.constant 0 : index
    %c0_8 = arith.constant 0 : index
    %10 = vector.load %arg6[%c0_7, %c0_8] : memref<128x128xbf16, #tpu.memory_space<vmem>>, vector<128x128xbf16>
    %cst_9 = arith.constant dense<0.000000e+00> : vector<32x128xf32>
    %11 = tpu.matmul %3, %10, %cst_9 {dimension_numbers = #tpu.dot_dimension_numbers<[1], [0], [0], [1], [0, 0, 1, 1], [], []>} : vector<32x128xbf16>, vector<128x128xbf16>, vector<32x128xf32> -> vector<32x128xf32>
    %c0_10 = arith.constant 0 : index
    %c0_11 = arith.constant 0 : index
    %12 = vector.load %arg7[%c0_10, %c0_11] : memref<1x128xf32, #tpu.memory_space<vmem>>, vector<1x128xf32>
    %13 = vector.broadcast %12 : vector<1x128xf32> to vector<32x128xf32>
    %14 = arith.addf %11, %13 : vector<32x128xf32>
    %15 = arith.truncf %14 : vector<32x128xf32> to vector<32x128xbf16>
    %c0_12 = arith.constant 0 : index
    %c0_13 = arith.constant 0 : index
    %16 = vector.load %arg8[%c0_12, %c0_13] : memref<128x128xbf16, #tpu.memory_space<vmem>>, vector<128x128xbf16>
    %cst_14 = arith.constant dense<0.000000e+00> : vector<32x128xf32>
    %17 = tpu.matmul %3, %16, %cst_14 {dimension_numbers = #tpu.dot_dimension_numbers<[1], [0], [0], [1], [0, 0, 1, 1], [], []>} : vector<32x128xbf16>, vector<128x128xbf16>, vector<32x128xf32> -> vector<32x128xf32>
    %c0_15 = arith.constant 0 : index
    %c0_16 = arith.constant 0 : index
    %18 = vector.load %arg9[%c0_15, %c0_16] : memref<1x128xf32, #tpu.memory_space<vmem>>, vector<1x128xf32>
    %19 = vector.broadcast %18 : vector<1x128xf32> to vector<32x128xf32>
    %20 = arith.addf %17, %19 : vector<32x128xf32>
    %21 = arith.truncf %20 : vector<32x128xf32> to vector<32x128xbf16>
    %22 = vector.shape_cast %9 : vector<16x128xbf16> to vector<2x8x128xbf16>
    %23 = vector.shape_cast %15 : vector<32x128xbf16> to vector<2x16x128xbf16>
    %24 = vector.shape_cast %21 : vector<32x128xbf16> to vector<2x16x128xbf16>
    %c0_17 = arith.constant 0 : index
    %c0_18 = arith.constant 0 : index
    %c0_19 = arith.constant 0 : index
    %25 = vector.load %arg3[%c0_17, %c0_18, %c0_19] : memref<2x1x16xf32, #tpu.memory_space<vmem>>, vector<2x1x16xf32>
    %26 = vector.extract_strided_slice %22 {offsets = [0, 0, 0], sizes = [2, 8, 16], strides = [1, 1, 1]} : vector<2x8x128xbf16> to vector<2x8x16xbf16>
    %27 = vector.extract_strided_slice %23 {offsets = [0, 0, 0], sizes = [2, 16, 16], strides = [1, 1, 1]} : vector<2x16x128xbf16> to vector<2x16x16xbf16>
    "tpu.trace_start"() <{level = 10 : i32, message = "bnd,bld->bnl"}> : () -> ()
    %cst_20 = arith.constant dense<0.000000e+00> : vector<2x8x16xf32>
    %28 = tpu.matmul %26, %27, %cst_20 {dimension_numbers = #tpu.dot_dimension_numbers<[2], [2], [1], [1], [0, 0, 0, 1, 1, 1], [0], [0]>} : vector<2x8x16xbf16>, vector<2x16x16xbf16>, vector<2x8x16xf32> -> vector<2x8x16xf32>
    "tpu.trace_stop"() : () -> ()
    %29 = vector.broadcast %25 : vector<2x1x16xf32> to vector<2x8x16xf32>
    %30 = arith.addf %28, %29 : vector<2x8x16xf32>
    %cst_21 = arith.constant dense<0xFF800000> : vector<2x8xf32>
    %31 = vector.multi_reduction <maximumf>, %30, %cst_21 [2] : vector<2x8x16xf32> to vector<2x8xf32>
    %32 = vector.shape_cast %31 : vector<2x8xf32> to vector<2x8x1xf32>
    %33 = vector.broadcast %32 : vector<2x8x1xf32> to vector<2x8x16xf32>
    %34 = arith.subf %30, %33 : vector<2x8x16xf32>
    %35 = math.exp %34 : vector<2x8x16xf32>
    %cst_22 = arith.constant dense<0.000000e+00> : vector<2x8xf32>
    %36 = vector.multi_reduction <add>, %35, %cst_22 [2] : vector<2x8x16xf32> to vector<2x8xf32>
    %37 = vector.shape_cast %36 : vector<2x8xf32> to vector<2x8x1xf32>
    %38 = arith.truncf %35 : vector<2x8x16xf32> to vector<2x8x16xbf16>
    %39 = vector.extract_strided_slice %24 {offsets = [0, 0, 0], sizes = [2, 16, 16], strides = [1, 1, 1]} : vector<2x16x128xbf16> to vector<2x16x16xbf16>
    "tpu.trace_start"() <{level = 10 : i32, message = "bnl,bld->bnd"}> : () -> ()
    %cst_23 = arith.constant dense<0.000000e+00> : vector<2x8x16xf32>
    %40 = tpu.matmul %38, %39, %cst_23 {dimension_numbers = #tpu.dot_dimension_numbers<[2], [1], [1], [2], [0, 0, 0, 1, 1, 2], [0], [0]>} : vector<2x8x16xbf16>, vector<2x16x16xbf16>, vector<2x8x16xf32> -> vector<2x8x16xf32>
    "tpu.trace_stop"() : () -> ()
    %41 = tpu.reciprocal %37 {approx = true} : vector<2x8x1xf32> -> vector<2x8x1xf32>
    %42 = vector.broadcast %41 : vector<2x8x1xf32> to vector<2x8x16xf32>
    %43 = arith.mulf %40, %42 : vector<2x8x16xf32>
    %44 = vector.shape_cast %43 : vector<2x8x16xf32> to vector<16x16xf32>
    %45 = arith.truncf %44 : vector<16x16xf32> to vector<16x16xbf16>
    %c0_24 = arith.constant 0 : index
    %c0_25 = arith.constant 0 : index
    %46 = vector.load %arg13[%c0_24, %c0_25] : memref<16x128xbf16, #tpu.memory_space<vmem>>, vector<16x16xbf16>
    tpu.vector_store %arg13[%c0_24, %c0_25], %45 {strides = array<i32>} : memref<16x128xbf16, #tpu.memory_space<vmem>>, vector<16x16xbf16>,
    %47 = vector.extract_strided_slice %22 {offsets = [0, 0, 16], sizes = [2, 8, 16], strides = [1, 1, 1]} : vector<2x8x128xbf16> to vector<2x8x16xbf16>
    %48 = vector.extract_strided_slice %23 {offsets = [0, 0, 16], sizes = [2, 16, 16], strides = [1, 1, 1]} : vector<2x16x128xbf16> to vector<2x16x16xbf16>
    "tpu.trace_start"() <{level = 10 : i32, message = "bnd,bld->bnl"}> : () -> ()
    %cst_26 = arith.constant dense<0.000000e+00> : vector<2x8x16xf32>
    %49 = tpu.matmul %47, %48, %cst_26 {dimension_numbers = #tpu.dot_dimension_numbers<[2], [2], [1], [1], [0, 0, 0, 1, 1, 1], [0], [0]>} : vector<2x8x16xbf16>, vector<2x16x16xbf16>, vector<2x8x16xf32> -> vector<2x8x16xf32>
    "tpu.trace_stop"() : () -> ()
    %50 = vector.broadcast %25 : vector<2x1x16xf32> to vector<2x8x16xf32>
    %51 = arith.addf %49, %50 : vector<2x8x16xf32>
    %cst_27 = arith.constant dense<0xFF800000> : vector<2x8xf32>
    %52 = vector.multi_reduction <maximumf>, %51, %cst_27 [2] : vector<2x8x16xf32> to vector<2x8xf32>
    %53 = vector.shape_cast %52 : vector<2x8xf32> to vector<2x8x1xf32>
    %54 = vector.broadcast %53 : vector<2x8x1xf32> to vector<2x8x16xf32>
    %55 = arith.subf %51, %54 : vector<2x8x16xf32>
    %56 = math.exp %55 : vector<2x8x16xf32>
    %cst_28 = arith.constant dense<0.000000e+00> : vector<2x8xf32>
    %57 = vector.multi_reduction <add>, %56, %cst_28 [2] : vector<2x8x16xf32> to vector<2x8xf32>
    %58 = vector.shape_cast %57 : vector<2x8xf32> to vector<2x8x1xf32>
    %59 = arith.truncf %56 : vector<2x8x16xf32> to vector<2x8x16xbf16>
    %60 = vector.extract_strided_slice %24 {offsets = [0, 0, 16], sizes = [2, 16, 16], strides = [1, 1, 1]} : vector<2x16x128xbf16> to vector<2x16x16xbf16>
    "tpu.trace_start"() <{level = 10 : i32, message = "bnl,bld->bnd"}> : () -> ()
    %cst_29 = arith.constant dense<0.000000e+00> : vector<2x8x16xf32>
    %61 = tpu.matmul %59, %60, %cst_29 {dimension_numbers = #tpu.dot_dimension_numbers<[2], [1], [1], [2], [0, 0, 0, 1, 1, 2], [0], [0]>} : vector<2x8x16xbf16>, vector<2x16x16xbf16>, vector<2x8x16xf32> -> vector<2x8x16xf32>
    "tpu.trace_stop"() : () -> ()
    %62 = tpu.reciprocal %58 {approx = true} : vector<2x8x1xf32> -> vector<2x8x1xf32>
    %63 = vector.broadcast %62 : vector<2x8x1xf32> to vector<2x8x16xf32>
    %64 = arith.mulf %61, %63 : vector<2x8x16xf32>
    %65 = vector.shape_cast %64 : vector<2x8x16xf32> to vector<16x16xf32>
    %66 = arith.truncf %65 : vector<16x16xf32> to vector<16x16xbf16>
    %c0_30 = arith.constant 0 : index
    %c16 = arith.constant 16 : index
    %67 = vector.load %arg13[%c0_30, %c16] : memref<16x128xbf16, #tpu.memory_space<vmem>>, vector<16x16xbf16>
    tpu.vector_store %arg13[%c0_30, %c16], %66 {strides = array<i32>} : memref<16x128xbf16, #tpu.memory_space<vmem>>, vector<16x16xbf16>,
    %68 = vector.extract_strided_slice %22 {offsets = [0, 0, 32], sizes = [2, 8, 16], strides = [1, 1, 1]} : vector<2x8x128xbf16> to vector<2x8x16xbf16>
    %69 = vector.extract_strided_slice %23 {offsets = [0, 0, 32], sizes = [2, 16, 16], strides = [1, 1, 1]} : vector<2x16x128xbf16> to vector<2x16x16xbf16>
    "tpu.trace_start"() <{level = 10 : i32, message = "bnd,bld->bnl"}> : () -> ()
    %cst_31 = arith.constant dense<0.000000e+00> : vector<2x8x16xf32>
    %70 = tpu.matmul %68, %69, %cst_31 {dimension_numbers = #tpu.dot_dimension_numbers<[2], [2], [1], [1], [0, 0, 0, 1, 1, 1], [0], [0]>} : vector<2x8x16xbf16>, vector<2x16x16xbf16>, vector<2x8x16xf32> -> vector<2x8x16xf32>
    "tpu.trace_stop"() : () -> ()
    %71 = vector.broadcast %25 : vector<2x1x16xf32> to vector<2x8x16xf32>
    %72 = arith.addf %70, %71 : vector<2x8x16xf32>
    %cst_32 = arith.constant dense<0xFF800000> : vector<2x8xf32>
    %73 = vector.multi_reduction <maximumf>, %72, %cst_32 [2] : vector<2x8x16xf32> to vector<2x8xf32>
    %74 = vector.shape_cast %73 : vector<2x8xf32> to vector<2x8x1xf32>
    %75 = vector.broadcast %74 : vector<2x8x1xf32> to vector<2x8x16xf32>
    %76 = arith.subf %72, %75 : vector<2x8x16xf32>
    %77 = math.exp %76 : vector<2x8x16xf32>
    %cst_33 = arith.constant dense<0.000000e+00> : vector<2x8xf32>
    %78 = vector.multi_reduction <add>, %77, %cst_33 [2] : vector<2x8x16xf32> to vector<2x8xf32>
    %79 = vector.shape_cast %78 : vector<2x8xf32> to vector<2x8x1xf32>
    %80 = arith.truncf %77 : vector<2x8x16xf32> to vector<2x8x16xbf16>
    %81 = vector.extract_strided_slice %24 {offsets = [0, 0, 32], sizes = [2, 16, 16], strides = [1, 1, 1]} : vector<2x16x128xbf16> to vector<2x16x16xbf16>
    "tpu.trace_start"() <{level = 10 : i32, message = "bnl,bld->bnd"}> : () -> ()
    %cst_34 = arith.constant dense<0.000000e+00> : vector<2x8x16xf32>
    %82 = tpu.matmul %80, %81, %cst_34 {dimension_numbers = #tpu.dot_dimension_numbers<[2], [1], [1], [2], [0, 0, 0, 1, 1, 2], [0], [0]>} : vector<2x8x16xbf16>, vector<2x16x16xbf16>, vector<2x8x16xf32> -> vector<2x8x16xf32>
    "tpu.trace_stop"() : () -> ()
    %83 = tpu.reciprocal %79 {approx = true} : vector<2x8x1xf32> -> vector<2x8x1xf32>
    %84 = vector.broadcast %83 : vector<2x8x1xf32> to vector<2x8x16xf32>
    %85 = arith.mulf %82, %84 : vector<2x8x16xf32>
    %86 = vector.shape_cast %85 : vector<2x8x16xf32> to vector<16x16xf32>
    %87 = arith.truncf %86 : vector<16x16xf32> to vector<16x16xbf16>
    %c0_35 = arith.constant 0 : index
    %c32 = arith.constant 32 : index
    %88 = vector.load %arg13[%c0_35, %c32] : memref<16x128xbf16, #tpu.memory_space<vmem>>, vector<16x16xbf16>
    tpu.vector_store %arg13[%c0_35, %c32], %87 {strides = array<i32>} : memref<16x128xbf16, #tpu.memory_space<vmem>>, vector<16x16xbf16>,
    %89 = vector.extract_strided_slice %22 {offsets = [0, 0, 48], sizes = [2, 8, 16], strides = [1, 1, 1]} : vector<2x8x128xbf16> to vector<2x8x16xbf16>
    %90 = vector.extract_strided_slice %23 {offsets = [0, 0, 48], sizes = [2, 16, 16], strides = [1, 1, 1]} : vector<2x16x128xbf16> to vector<2x16x16xbf16>
    "tpu.trace_start"() <{level = 10 : i32, message = "bnd,bld->bnl"}> : () -> ()
    %cst_36 = arith.constant dense<0.000000e+00> : vector<2x8x16xf32>
    %91 = tpu.matmul %89, %90, %cst_36 {dimension_numbers = #tpu.dot_dimension_numbers<[2], [2], [1], [1], [0, 0, 0, 1, 1, 1], [0], [0]>} : vector<2x8x16xbf16>, vector<2x16x16xbf16>, vector<2x8x16xf32> -> vector<2x8x16xf32>
    "tpu.trace_stop"() : () -> ()
    %92 = vector.broadcast %25 : vector<2x1x16xf32> to vector<2x8x16xf32>
    %93 = arith.addf %91, %92 : vector<2x8x16xf32>
    %cst_37 = arith.constant dense<0xFF800000> : vector<2x8xf32>
    %94 = vector.multi_reduction <maximumf>, %93, %cst_37 [2] : vector<2x8x16xf32> to vector<2x8xf32>
    %95 = vector.shape_cast %94 : vector<2x8xf32> to vector<2x8x1xf32>
    %96 = vector.broadcast %95 : vector<2x8x1xf32> to vector<2x8x16xf32>
    %97 = arith.subf %93, %96 : vector<2x8x16xf32>
    %98 = math.exp %97 : vector<2x8x16xf32>
    %cst_38 = arith.constant dense<0.000000e+00> : vector<2x8xf32>
    %99 = vector.multi_reduction <add>, %98, %cst_38 [2] : vector<2x8x16xf32> to vector<2x8xf32>
    %100 = vector.shape_cast %99 : vector<2x8xf32> to vector<2x8x1xf32>
    %101 = arith.truncf %98 : vector<2x8x16xf32> to vector<2x8x16xbf16>
    %102 = vector.extract_strided_slice %24 {offsets = [0, 0, 48], sizes = [2, 16, 16], strides = [1, 1, 1]} : vector<2x16x128xbf16> to vector<2x16x16xbf16>
    "tpu.trace_start"() <{level = 10 : i32, message = "bnl,bld->bnd"}> : () -> ()
    %cst_39 = arith.constant dense<0.000000e+00> : vector<2x8x16xf32>
    %103 = tpu.matmul %101, %102, %cst_39 {dimension_numbers = #tpu.dot_dimension_numbers<[2], [1], [1], [2], [0, 0, 0, 1, 1, 2], [0], [0]>} : vector<2x8x16xbf16>, vector<2x16x16xbf16>, vector<2x8x16xf32> -> vector<2x8x16xf32>
    "tpu.trace_stop"() : () -> ()
    %104 = tpu.reciprocal %100 {approx = true} : vector<2x8x1xf32> -> vector<2x8x1xf32>
    %105 = vector.broadcast %104 : vector<2x8x1xf32> to vector<2x8x16xf32>
    %106 = arith.mulf %103, %105 : vector<2x8x16xf32>
    %107 = vector.shape_cast %106 : vector<2x8x16xf32> to vector<16x16xf32>
    %108 = arith.truncf %107 : vector<16x16xf32> to vector<16x16xbf16>
    %c0_40 = arith.constant 0 : index
    %c48 = arith.constant 48 : index
    %109 = vector.load %arg13[%c0_40, %c48] : memref<16x128xbf16, #tpu.memory_space<vmem>>, vector<16x16xbf16>
    tpu.vector_store %arg13[%c0_40, %c48], %108 {strides = array<i32>} : memref<16x128xbf16, #tpu.memory_space<vmem>>, vector<16x16xbf16>,
    %110 = vector.extract_strided_slice %22 {offsets = [0, 0, 64], sizes = [2, 8, 16], strides = [1, 1, 1]} : vector<2x8x128xbf16> to vector<2x8x16xbf16>
    %111 = vector.extract_strided_slice %23 {offsets = [0, 0, 64], sizes = [2, 16, 16], strides = [1, 1, 1]} : vector<2x16x128xbf16> to vector<2x16x16xbf16>
    "tpu.trace_start"() <{level = 10 : i32, message = "bnd,bld->bnl"}> : () -> ()
    %cst_41 = arith.constant dense<0.000000e+00> : vector<2x8x16xf32>
    %112 = tpu.matmul %110, %111, %cst_41 {dimension_numbers = #tpu.dot_dimension_numbers<[2], [2], [1], [1], [0, 0, 0, 1, 1, 1], [0], [0]>} : vector<2x8x16xbf16>, vector<2x16x16xbf16>, vector<2x8x16xf32> -> vector<2x8x16xf32>
    "tpu.trace_stop"() : () -> ()
    %113 = vector.broadcast %25 : vector<2x1x16xf32> to vector<2x8x16xf32>
    %114 = arith.addf %112, %113 : vector<2x8x16xf32>
    %cst_42 = arith.constant dense<0xFF800000> : vector<2x8xf32>
    %115 = vector.multi_reduction <maximumf>, %114, %cst_42 [2] : vector<2x8x16xf32> to vector<2x8xf32>
    %116 = vector.shape_cast %115 : vector<2x8xf32> to vector<2x8x1xf32>
    %117 = vector.broadcast %116 : vector<2x8x1xf32> to vector<2x8x16xf32>
    %118 = arith.subf %114, %117 : vector<2x8x16xf32>
    %119 = math.exp %118 : vector<2x8x16xf32>
    %cst_43 = arith.constant dense<0.000000e+00> : vector<2x8xf32>
    %120 = vector.multi_reduction <add>, %119, %cst_43 [2] : vector<2x8x16xf32> to vector<2x8xf32>
    %121 = vector.shape_cast %120 : vector<2x8xf32> to vector<2x8x1xf32>
    %122 = arith.truncf %119 : vector<2x8x16xf32> to vector<2x8x16xbf16>
    %123 = vector.extract_strided_slice %24 {offsets = [0, 0, 64], sizes = [2, 16, 16], strides = [1, 1, 1]} : vector<2x16x128xbf16> to vector<2x16x16xbf16>
    "tpu.trace_start"() <{level = 10 : i32, message = "bnl,bld->bnd"}> : () -> ()
    %cst_44 = arith.constant dense<0.000000e+00> : vector<2x8x16xf32>
    %124 = tpu.matmul %122, %123, %cst_44 {dimension_numbers = #tpu.dot_dimension_numbers<[2], [1], [1], [2], [0, 0, 0, 1, 1, 2], [0], [0]>} : vector<2x8x16xbf16>, vector<2x16x16xbf16>, vector<2x8x16xf32> -> vector<2x8x16xf32>
    "tpu.trace_stop"() : () -> ()
    %125 = tpu.reciprocal %121 {approx = true} : vector<2x8x1xf32> -> vector<2x8x1xf32>
    %126 = vector.broadcast %125 : vector<2x8x1xf32> to vector<2x8x16xf32>
    %127 = arith.mulf %124, %126 : vector<2x8x16xf32>
    %128 = vector.shape_cast %127 : vector<2x8x16xf32> to vector<16x16xf32>
    %129 = arith.truncf %128 : vector<16x16xf32> to vector<16x16xbf16>
    %c0_45 = arith.constant 0 : index
    %c64 = arith.constant 64 : index
    %130 = vector.load %arg13[%c0_45, %c64] : memref<16x128xbf16, #tpu.memory_space<vmem>>, vector<16x16xbf16>
    tpu.vector_store %arg13[%c0_45, %c64], %129 {strides = array<i32>} : memref<16x128xbf16, #tpu.memory_space<vmem>>, vector<16x16xbf16>,
    %131 = vector.extract_strided_slice %22 {offsets = [0, 0, 80], sizes = [2, 8, 16], strides = [1, 1, 1]} : vector<2x8x128xbf16> to vector<2x8x16xbf16>
    %132 = vector.extract_strided_slice %23 {offsets = [0, 0, 80], sizes = [2, 16, 16], strides = [1, 1, 1]} : vector<2x16x128xbf16> to vector<2x16x16xbf16>
    "tpu.trace_start"() <{level = 10 : i32, message = "bnd,bld->bnl"}> : () -> ()
    %cst_46 = arith.constant dense<0.000000e+00> : vector<2x8x16xf32>
    %133 = tpu.matmul %131, %132, %cst_46 {dimension_numbers = #tpu.dot_dimension_numbers<[2], [2], [1], [1], [0, 0, 0, 1, 1, 1], [0], [0]>} : vector<2x8x16xbf16>, vector<2x16x16xbf16>, vector<2x8x16xf32> -> vector<2x8x16xf32>
    "tpu.trace_stop"() : () -> ()
    %134 = vector.broadcast %25 : vector<2x1x16xf32> to vector<2x8x16xf32>
    %135 = arith.addf %133, %134 : vector<2x8x16xf32>
    %cst_47 = arith.constant dense<0xFF800000> : vector<2x8xf32>
    %136 = vector.multi_reduction <maximumf>, %135, %cst_47 [2] : vector<2x8x16xf32> to vector<2x8xf32>
    %137 = vector.shape_cast %136 : vector<2x8xf32> to vector<2x8x1xf32>
    %138 = vector.broadcast %137 : vector<2x8x1xf32> to vector<2x8x16xf32>
    %139 = arith.subf %135, %138 : vector<2x8x16xf32>
    %140 = math.exp %139 : vector<2x8x16xf32>
    %cst_48 = arith.constant dense<0.000000e+00> : vector<2x8xf32>
    %141 = vector.multi_reduction <add>, %140, %cst_48 [2] : vector<2x8x16xf32> to vector<2x8xf32>
    %142 = vector.shape_cast %141 : vector<2x8xf32> to vector<2x8x1xf32>
    %143 = arith.truncf %140 : vector<2x8x16xf32> to vector<2x8x16xbf16>
    %144 = vector.extract_strided_slice %24 {offsets = [0, 0, 80], sizes = [2, 16, 16], strides = [1, 1, 1]} : vector<2x16x128xbf16> to vector<2x16x16xbf16>
    "tpu.trace_start"() <{level = 10 : i32, message = "bnl,bld->bnd"}> : () -> ()
    %cst_49 = arith.constant dense<0.000000e+00> : vector<2x8x16xf32>
    %145 = tpu.matmul %143, %144, %cst_49 {dimension_numbers = #tpu.dot_dimension_numbers<[2], [1], [1], [2], [0, 0, 0, 1, 1, 2], [0], [0]>} : vector<2x8x16xbf16>, vector<2x16x16xbf16>, vector<2x8x16xf32> -> vector<2x8x16xf32>
    "tpu.trace_stop"() : () -> ()
    %146 = tpu.reciprocal %142 {approx = true} : vector<2x8x1xf32> -> vector<2x8x1xf32>
    %147 = vector.broadcast %146 : vector<2x8x1xf32> to vector<2x8x16xf32>
    %148 = arith.mulf %145, %147 : vector<2x8x16xf32>
    %149 = vector.shape_cast %148 : vector<2x8x16xf32> to vector<16x16xf32>
    %150 = arith.truncf %149 : vector<16x16xf32> to vector<16x16xbf16>
    %c0_50 = arith.constant 0 : index
    %c80 = arith.constant 80 : index
    %151 = vector.load %arg13[%c0_50, %c80] : memref<16x128xbf16, #tpu.memory_space<vmem>>, vector<16x16xbf16>
    tpu.vector_store %arg13[%c0_50, %c80], %150 {strides = array<i32>} : memref<16x128xbf16, #tpu.memory_space<vmem>>, vector<16x16xbf16>,
    %152 = vector.extract_strided_slice %22 {offsets = [0, 0, 96], sizes = [2, 8, 16], strides = [1, 1, 1]} : vector<2x8x128xbf16> to vector<2x8x16xbf16>
    %153 = vector.extract_strided_slice %23 {offsets = [0, 0, 96], sizes = [2, 16, 16], strides = [1, 1, 1]} : vector<2x16x128xbf16> to vector<2x16x16xbf16>
    "tpu.trace_start"() <{level = 10 : i32, message = "bnd,bld->bnl"}> : () -> ()
    %cst_51 = arith.constant dense<0.000000e+00> : vector<2x8x16xf32>
    %154 = tpu.matmul %152, %153, %cst_51 {dimension_numbers = #tpu.dot_dimension_numbers<[2], [2], [1], [1], [0, 0, 0, 1, 1, 1], [0], [0]>} : vector<2x8x16xbf16>, vector<2x16x16xbf16>, vector<2x8x16xf32> -> vector<2x8x16xf32>
    "tpu.trace_stop"() : () -> ()
    %155 = vector.broadcast %25 : vector<2x1x16xf32> to vector<2x8x16xf32>
    %156 = arith.addf %154, %155 : vector<2x8x16xf32>
    %cst_52 = arith.constant dense<0xFF800000> : vector<2x8xf32>
    %157 = vector.multi_reduction <maximumf>, %156, %cst_52 [2] : vector<2x8x16xf32> to vector<2x8xf32>
    %158 = vector.shape_cast %157 : vector<2x8xf32> to vector<2x8x1xf32>
    %159 = vector.broadcast %158 : vector<2x8x1xf32> to vector<2x8x16xf32>
    %160 = arith.subf %156, %159 : vector<2x8x16xf32>
    %161 = math.exp %160 : vector<2x8x16xf32>
    %cst_53 = arith.constant dense<0.000000e+00> : vector<2x8xf32>
    %162 = vector.multi_reduction <add>, %161, %cst_53 [2] : vector<2x8x16xf32> to vector<2x8xf32>
    %163 = vector.shape_cast %162 : vector<2x8xf32> to vector<2x8x1xf32>
    %164 = arith.truncf %161 : vector<2x8x16xf32> to vector<2x8x16xbf16>
    %165 = vector.extract_strided_slice %24 {offsets = [0, 0, 96], sizes = [2, 16, 16], strides = [1, 1, 1]} : vector<2x16x128xbf16> to vector<2x16x16xbf16>
    "tpu.trace_start"() <{level = 10 : i32, message = "bnl,bld->bnd"}> : () -> ()
    %cst_54 = arith.constant dense<0.000000e+00> : vector<2x8x16xf32>
    %166 = tpu.matmul %164, %165, %cst_54 {dimension_numbers = #tpu.dot_dimension_numbers<[2], [1], [1], [2], [0, 0, 0, 1, 1, 2], [0], [0]>} : vector<2x8x16xbf16>, vector<2x16x16xbf16>, vector<2x8x16xf32> -> vector<2x8x16xf32>
    "tpu.trace_stop"() : () -> ()
    %167 = tpu.reciprocal %163 {approx = true} : vector<2x8x1xf32> -> vector<2x8x1xf32>
    %168 = vector.broadcast %167 : vector<2x8x1xf32> to vector<2x8x16xf32>
    %169 = arith.mulf %166, %168 : vector<2x8x16xf32>
    %170 = vector.shape_cast %169 : vector<2x8x16xf32> to vector<16x16xf32>
    %171 = arith.truncf %170 : vector<16x16xf32> to vector<16x16xbf16>
    %c0_55 = arith.constant 0 : index
    %c96 = arith.constant 96 : index
    %172 = vector.load %arg13[%c0_55, %c96] : memref<16x128xbf16, #tpu.memory_space<vmem>>, vector<16x16xbf16>
    tpu.vector_store %arg13[%c0_55, %c96], %171 {strides = array<i32>} : memref<16x128xbf16, #tpu.memory_space<vmem>>, vector<16x16xbf16>,
    %173 = vector.extract_strided_slice %22 {offsets = [0, 0, 112], sizes = [2, 8, 16], strides = [1, 1, 1]} : vector<2x8x128xbf16> to vector<2x8x16xbf16>
    %174 = vector.extract_strided_slice %23 {offsets = [0, 0, 112], sizes = [2, 16, 16], strides = [1, 1, 1]} : vector<2x16x128xbf16> to vector<2x16x16xbf16>
    "tpu.trace_start"() <{level = 10 : i32, message = "bnd,bld->bnl"}> : () -> ()
    %cst_56 = arith.constant dense<0.000000e+00> : vector<2x8x16xf32>
    %175 = tpu.matmul %173, %174, %cst_56 {dimension_numbers = #tpu.dot_dimension_numbers<[2], [2], [1], [1], [0, 0, 0, 1, 1, 1], [0], [0]>} : vector<2x8x16xbf16>, vector<2x16x16xbf16>, vector<2x8x16xf32> -> vector<2x8x16xf32>
    "tpu.trace_stop"() : () -> ()
    %176 = vector.broadcast %25 : vector<2x1x16xf32> to vector<2x8x16xf32>
    %177 = arith.addf %175, %176 : vector<2x8x16xf32>
    %cst_57 = arith.constant dense<0xFF800000> : vector<2x8xf32>
    %178 = vector.multi_reduction <maximumf>, %177, %cst_57 [2] : vector<2x8x16xf32> to vector<2x8xf32>
    %179 = vector.shape_cast %178 : vector<2x8xf32> to vector<2x8x1xf32>
    %180 = vector.broadcast %179 : vector<2x8x1xf32> to vector<2x8x16xf32>
    %181 = arith.subf %177, %180 : vector<2x8x16xf32>
    %182 = math.exp %181 : vector<2x8x16xf32>
    %cst_58 = arith.constant dense<0.000000e+00> : vector<2x8xf32>
    %183 = vector.multi_reduction <add>, %182, %cst_58 [2] : vector<2x8x16xf32> to vector<2x8xf32>
    %184 = vector.shape_cast %183 : vector<2x8xf32> to vector<2x8x1xf32>
    %185 = arith.truncf %182 : vector<2x8x16xf32> to vector<2x8x16xbf16>
    %186 = vector.extract_strided_slice %24 {offsets = [0, 0, 112], sizes = [2, 16, 16], strides = [1, 1, 1]} : vector<2x16x128xbf16> to vector<2x16x16xbf16>
    "tpu.trace_start"() <{level = 10 : i32, message = "bnl,bld->bnd"}> : () -> ()
    %cst_59 = arith.constant dense<0.000000e+00> : vector<2x8x16xf32>
    %187 = tpu.matmul %185, %186, %cst_59 {dimension_numbers = #tpu.dot_dimension_numbers<[2], [1], [1], [2], [0, 0, 0, 1, 1, 2], [0], [0]>} : vector<2x8x16xbf16>, vector<2x16x16xbf16>, vector<2x8x16xf32> -> vector<2x8x16xf32>
    "tpu.trace_stop"() : () -> ()
    %188 = tpu.reciprocal %184 {approx = true} : vector<2x8x1xf32> -> vector<2x8x1xf32>
    %189 = vector.broadcast %188 : vector<2x8x1xf32> to vector<2x8x16xf32>
    %190 = arith.mulf %187, %189 : vector<2x8x16xf32>
    %191 = vector.shape_cast %190 : vector<2x8x16xf32> to vector<16x16xf32>
    %192 = arith.truncf %191 : vector<16x16xf32> to vector<16x16xbf16>
    %c0_60 = arith.constant 0 : index
    %c112 = arith.constant 112 : index
    %193 = vector.load %arg13[%c0_60, %c112] : memref<16x128xbf16, #tpu.memory_space<vmem>>, vector<16x16xbf16>
    tpu.vector_store %arg13[%c0_60, %c112], %192 {strides = array<i32>} : memref<16x128xbf16, #tpu.memory_space<vmem>>, vector<16x16xbf16>,
    %c0_61 = arith.constant 0 : index
    %c0_62 = arith.constant 0 : index
    %194 = vector.load %arg13[%c0_61, %c0_62] : memref<16x128xbf16, #tpu.memory_space<vmem>>, vector<16x128xbf16>
    %c0_63 = arith.constant 0 : index
    %c0_64 = arith.constant 0 : index
    %195 = vector.load %arg10[%c0_63, %c0_64] : memref<128x128xbf16, #tpu.memory_space<vmem>>, vector<128x128xbf16>
    %cst_65 = arith.constant dense<0.000000e+00> : vector<16x128xf32>
    %196 = tpu.matmul %194, %195, %cst_65 {dimension_numbers = #tpu.dot_dimension_numbers<[1], [0], [0], [1], [0, 0, 1, 1], [], []>} : vector<16x128xbf16>, vector<128x128xbf16>, vector<16x128xf32> -> vector<16x128xf32>
    %c0_66 = arith.constant 0 : index
    %c0_67 = arith.constant 0 : index
    %197 = vector.load %arg11[%c0_66, %c0_67] : memref<1x128xf32, #tpu.memory_space<vmem>>, vector<1x128xf32>
    %198 = vector.broadcast %197 : vector<1x128xf32> to vector<16x128xf32>
    %199 = arith.addf %196, %198 : vector<16x128xf32>
    %c0_68 = arith.constant 0 : index
    %c0_69 = arith.constant 0 : index
    %200 = vector.load %arg12[%c0_68, %c0_69] : memref<16x128xf32, #tpu.memory_space<vmem>>, vector<16x128xf32>
    tpu.vector_store %arg12[%c0_68, %c0_69], %199 {strides = array<i32>} : memref<16x128xf32, #tpu.memory_space<vmem>>, vector<16x128xf32>,
    return
  }
  func.func @transform_0(%arg0: i32) -> (i32, i32) {
    %c0_i32 = arith.constant 0 : i32
    %c0_i32_0 = arith.constant 0 : i32
    return %arg0, %c0_i32 : i32, i32
  }
  func.func @transform_1(%arg0: i32) -> (i32, i32) {
    %c0_i32 = arith.constant 0 : i32
    %c0_i32_0 = arith.constant 0 : i32
    return %arg0, %c0_i32 : i32, i32
  }
  func.func @transform_2(%arg0: i32) -> (i32, i32, i32) {
    %c0_i32 = arith.constant 0 : i32
    %c0_i32_0 = arith.constant 0 : i32
    %c0_i32_1 = arith.constant 0 : i32
    return %arg0, %c0_i32, %c0_i32_0 : i32, i32, i32
  }
  func.func @transform_3(%arg0: i32) -> (i32, i32) {
    %c0_i32 = arith.constant 0 : i32
    %c0_i32_0 = arith.constant 0 : i32
    %c0_i32_1 = arith.constant 0 : i32
    return %c0_i32, %c0_i32_0 : i32, i32
  }
  func.func @transform_4(%arg0: i32) -> (i32, i32) {
    %c0_i32 = arith.constant 0 : i32
    %c0_i32_0 = arith.constant 0 : i32
    %c0_i32_1 = arith.constant 0 : i32
    return %c0_i32, %c0_i32_0 : i32, i32
  }
  func.func @transform_5(%arg0: i32) -> (i32, i32) {
    %c0_i32 = arith.constant 0 : i32
    %c0_i32_0 = arith.constant 0 : i32
    %c0_i32_1 = arith.constant 0 : i32
    return %c0_i32, %c0_i32_0 : i32, i32
  }
  func.func @transform_6(%arg0: i32) -> (i32, i32) {
    %c0_i32 = arith.constant 0 : i32
    %c0_i32_0 = arith.constant 0 : i32
    %c0_i32_1 = arith.constant 0 : i32
    return %c0_i32, %c0_i32_0 : i32, i32
  }
  func.func @transform_7(%arg0: i32) -> (i32, i32) {
    %c0_i32 = arith.constant 0 : i32
    %c0_i32_0 = arith.constant 0 : i32
    %c0_i32_1 = arith.constant 0 : i32
    return %c0_i32, %c0_i32_0 : i32, i32
  }
  func.func @transform_8(%arg0: i32) -> (i32, i32) {
    %c0_i32 = arith.constant 0 : i32
    %c0_i32_0 = arith.constant 0 : i32
    %c0_i32_1 = arith.constant 0 : i32
    return %c0_i32, %c0_i32_0 : i32, i32
  }
  func.func @transform_9(%arg0: i32) -> (i32, i32) {
    %c0_i32 = arith.constant 0 : i32
    %c0_i32_0 = arith.constant 0 : i32
    %c0_i32_1 = arith.constant 0 : i32
    return %c0_i32, %c0_i32_0 : i32, i32
  }
  func.func @transform_10(%arg0: i32) -> (i32, i32) {
    %c0_i32 = arith.constant 0 : i32
    %c0_i32_0 = arith.constant 0 : i32
    %c0_i32_1 = arith.constant 0 : i32
    return %c0_i32, %c0_i32_0 : i32, i32
  }
  func.func @transform_11(%arg0: i32) -> (i32, i32) {
    %c0_i32 = arith.constant 0 : i32
    %c0_i32_0 = arith.constant 0 : i32
    return %arg0, %c0_i32 : i32, i32
  }
}

</mosaic_0001>

<bundles_post_ra>
// kernel: tpu_custom_call.1
= control target key start
LH: loop header
LB: loop body
LE: loop exit
PB: predicated region body
PF: predicated region fallthrough
CT: control target
= control target key end

     0   :  { %16 = vsyncpa [#allocation4], 0  ;;  %s3778_s0 = inlined_call_operand.hbm [shape: f32[16,128], index: 0, kind: input, shape index: {}]   ;;  %s3779_s1 = inlined_call_operand.hbm [shape: f32[32,128], index: 1, kind: input, shape index: {}]   ;;  %s3780_s2 = inlined_call_operand.vmem [shape: f32[2,1,16], index: 2, kind: input, shape index: {}]   ;;  %s3781_s3 = inlined_call_operand.hbm [shape: bf16[128,128], index: 3, kind: input, shape index: {}]   ;;  %s3782_s4 = inlined_call_operand.vmem [shape: f32[1,128], index: 4, kind: input, shape index: {}]   ;;  %s3783_s5 = inlined_call_operand.hbm [shape: bf16[128,128], index: 5, kind: input, shape index: {}]   ;;  %s3784_s6 = inlined_call_operand.vmem [shape: f32[1,128], index: 6, kind: input, shape index: {}]   ;;  %s3785_s7 = inlined_call_operand.hbm [shape: bf16[128,128], index: 7, kind: input, shape index: {}]   ;;  %s3786_s8 = inlined_call_operand.vmem [shape: f32[1,128], index: 8, kind: input, shape index: {}]   ;;  %s3787_s9 = inlined_call_operand.hbm [shape: bf16[128,128], index: 9, kind: input, shape index: {}]   ;;  %s3788_s10 = inlined_call_operand.vmem [shape: f32[1,128], index: 10, kind: input, shape index: {}]   ;;  %s3789_s11 = inlined_call_operand.hbm [shape: f32[16,128], index: 11, kind: output, shape index: {}]  }
   0x1   :  { %17 = vsyncpa [#allocation7], 0 }
   0x2   :  { %18 = vsyncpa [#allocation10], 0 }
   0x3   :  { %19 = vsyncpa [#allocation13], 0 }
   0x4   :  { %20 = vsyncpa [#allocation5], 0  ;;  %s3139_s17 = smov [#allocation6]   ;;  %s2975_s21 = scalar_lea.hbm %s3779_s1, 512 }
   0x5   :  { %s38_s18 = sshll.u32 %s3139_s17, 4  ;;  %p2976_p0 = scmp.ne.s32.totalorder %s3779_s1, %s2975_s21  ;;  %s39_s18 = int_to_ptr.vmem [resolvable:$true] %s38_s18 }
   0x6   :  { %p2979_p1 = scmp.lt.u32.totalorder %s2975_s21, %s3779_s1 }
   0x8   :  { %p2981_p2 = pnand %p2979_p1, %p2976_p0 }
   0xa   :  { %2984 = shalt.err (!%p2981_p2)
}
   0xb   :  { %s2985_s26 = scalar_lea.vmem %s39_s18, 512  ;;  %p2990_p4 = scmp.lt.s32.totalorder %s39_s18, %s39_s18 }
   0xc   :  { %p2986_p3 = scmp.ne.s32.totalorder %s39_s18, %s2985_s26  ;;  %p2991_p5 = scmp.lt.s32.totalorder %s2985_s26, %s2985_s26 }
   0xe   :  { %p2992_p6 = por %p2991_p5, %p2990_p4 }
  0x10   :  { %p2993_p7 = pnand %p2992_p6, %p2986_p3 }
  0x12   :  { %2996 = shalt.err (!%p2993_p7)
}
  0x13   :  { %s3140_s27 = smov 128   ;;  %s3141_s28 = smov 8  }
  0x14   :  { %44 = dma.hbm_to_vmem [thread:$0]  %s3779_s1, 512, %s39_s18, [#allocation7], %s3140_s27, %s3140_s27, %s3141_s28  }
  0x15   :  { %s3142_s12 = smov [#allocation9]   ;;  %s3143_s14 = smov [#allocation3]  }
  0x16   :  { %s66_s13 = sshll.u32 %s3142_s12, 4  ;;  %s26_s15 = sshll.u32 %s3143_s14, 4  ;;  %s67_s13 = int_to_ptr.vmem [resolvable:$true] %s66_s13  ;;  %s27_s15 = int_to_ptr.vmem [resolvable:$true] %s26_s15 }
  0x17   :  { %s2997_s19 = scalar_lea.hbm %s3783_s5, 1024 }
  0x18   :  { %p2998_p8 = scmp.ne.s32.totalorder %s3783_s5, %s2997_s19  ;;  %p3001_p9 = scmp.lt.u32.totalorder %s2997_s19, %s3783_s5 }
  0x1a   :  { %p3003_p10 = pnand %p3001_p9, %p2998_p8 }
  0x1c   :  { %3006 = shalt.err (!%p3003_p10)
}
  0x1d   :  { %s3007_s1 = scalar_lea.vmem %s67_s13, 1024  ;;  %p3012_p12 = scmp.lt.s32.totalorder %s67_s13, %s67_s13 }
  0x1e   :  { %p3008_p11 = scmp.ne.s32.totalorder %s67_s13, %s3007_s1  ;;  %p3013_p13 = scmp.lt.s32.totalorder %s3007_s1, %s3007_s1 }
  0x20   :  { %p3014_p0 = por %p3013_p13, %p3012_p12 }
  0x22   :  { %p3015_p1 = pnand %p3014_p0, %p3008_p11 }
  0x24   :  { %3018 = shalt.err (!%p3015_p1)
}
  0x25   :  { %s3144_s18 = smov 64   ;;  %s3145_s24 = smov 4  }
  0x26   :  { %72 = dma.hbm_to_vmem [thread:$0]  %s3783_s5, 1024, %s67_s13, [#allocation10], %s3144_s18, %s3144_s18, %s3145_s24  }
  0x27   :  { %s3019_s12 = scalar_lea.hbm %s3778_s0, 256 }
  0x28   :  { %p3020_p2 = scmp.ne.s32.totalorder %s3778_s0, %s3019_s12  ;;  %p3023_p3 = scmp.lt.u32.totalorder %s3019_s12, %s3778_s0 }
  0x2a   :  { %p3025_p4 = pnand %p3023_p3, %p3020_p2 }
  0x2c   :  { %3028 = shalt.err (!%p3025_p4)
}
  0x2d   :  { %s3029_s20 = scalar_lea.vmem %s27_s15, 256  ;;  %p3034_p6 = scmp.lt.s32.totalorder %s27_s15, %s27_s15 }
  0x2e   :  { %p3030_p5 = scmp.ne.s32.totalorder %s27_s15, %s3029_s20  ;;  %p3035_p7 = scmp.lt.s32.totalorder %s3029_s20, %s3029_s20 }
  0x30   :  { %p3036_p8 = por %p3035_p7, %p3034_p6 }
  0x32   :  { %p3037_p9 = pnand %p3036_p8, %p3030_p5 }
  0x34   :  { %3040 = shalt.err (!%p3037_p9)
}
  0x35   :  { %32 = dma.hbm_to_vmem [thread:$0]  %s3778_s0, 256, %s27_s15, [#allocation4], %s3140_s27, %s3140_s27, %s3141_s28  }
  0x36   :  { %s3146_s21 = smov [#allocation8]   ;;  %s3147_s23 = smov [#allocation11]  }
  0x37   :  { %s52_s22 = sshll.u32 %s3146_s21, 4  ;;  %s80_s1 = sshll.u32 %s3147_s23, 4  ;;  %s53_s22 = int_to_ptr.vmem [resolvable:$true] %s52_s22  ;;  %s81_s1 = int_to_ptr.vmem [resolvable:$true] %s80_s1 }
  0x38   :  { %s3041_s29 = scalar_lea.hbm %s3781_s3, 1024 }
  0x39   :  { %p3042_p10 = scmp.ne.s32.totalorder %s3781_s3, %s3041_s29  ;;  %p3045_p11 = scmp.lt.u32.totalorder %s3041_s29, %s3781_s3 }
  0x3b   :  { %p3047_p12 = pnand %p3045_p11, %p3042_p10 }
  0x3d   :  { %3050 = shalt.err (!%p3047_p12)
}
  0x3e   :  { %s3051_s0 = scalar_lea.vmem %s53_s22, 1024  ;;  %p3056_p0 = scmp.lt.s32.totalorder %s53_s22, %s53_s22 }
  0x3f   :  { %p3052_p13 = scmp.ne.s32.totalorder %s53_s22, %s3051_s0  ;;  %p3057_p1 = scmp.lt.s32.totalorder %s3051_s0, %s3051_s0 }
  0x41   :  { %p3058_p2 = por %p3057_p1, %p3056_p0 }
  0x43   :  { %p3059_p3 = pnand %p3058_p2, %p3052_p13 }
  0x45   :  { %3062 = shalt.err (!%p3059_p3)
}
  0x46   :  { %58 = dma.hbm_to_vmem [thread:$0]  %s3781_s3, 1024, %s53_s22, [#allocation7], %s3144_s18, %s3144_s18, %s3145_s24  }
  0x47   :  { %s3063_s5 = scalar_lea.hbm %s3785_s7, 1024 }
  0x48   :  { %p3064_p4 = scmp.ne.s32.totalorder %s3785_s7, %s3063_s5  ;;  %p3067_p5 = scmp.lt.u32.totalorder %s3063_s5, %s3785_s7 }
  0x4a   :  { %p3069_p6 = pnand %p3067_p5, %p3064_p4 }
  0x4c   :  { %3072 = shalt.err (!%p3069_p6)
}
  0x4d   :  { %s3073_s26 = scalar_lea.vmem %s81_s1, 1024  ;;  %p3078_p8 = scmp.lt.s32.totalorder %s81_s1, %s81_s1 }
  0x4e   :  { %p3074_p7 = scmp.ne.s32.totalorder %s81_s1, %s3073_s26  ;;  %p3079_p9 = scmp.lt.s32.totalorder %s3073_s26, %s3073_s26 }
  0x50   :  { %p3080_p10 = por %p3079_p9, %p3078_p8 }
  0x52   :  { %p3081_p11 = pnand %p3080_p10, %p3074_p7 }
  0x54   :  { %3084 = shalt.err (!%p3081_p11)
}
  0x55   :  { %86 = dma.hbm_to_vmem [thread:$0]  %s3785_s7, 1024, %s81_s1, [#allocation10], %s3144_s18, %s3144_s18, %s3145_s24  }
  0x56   :  { %s3148_s29 = smov [#allocation12]   ;;  %s3085_s16 = scalar_lea.hbm %s3787_s9, 1024 }
  0x57   :  { %s94_s30 = sshll.u32 %s3148_s29, 4  ;;  %p3086_p12 = scmp.ne.s32.totalorder %s3787_s9, %s3085_s16  ;;  %s95_s30 = int_to_ptr.vmem [resolvable:$true] %s94_s30 }
  0x58   :  { %p3089_p13 = scmp.lt.u32.totalorder %s3085_s16, %s3787_s9 }
  0x5a   :  { %p3091_p0 = pnand %p3089_p13, %p3086_p12 }
  0x5c   :  { %3094 = shalt.err (!%p3091_p0)
}
  0x5d   :  { %s3095_s20 = scalar_lea.vmem %s95_s30, 1024  ;;  %p3100_p2 = scmp.lt.s32.totalorder %s95_s30, %s95_s30 }
  0x5e   :  { %p3096_p1 = scmp.ne.s32.totalorder %s95_s30, %s3095_s20  ;;  %p3101_p3 = scmp.lt.s32.totalorder %s3095_s20, %s3095_s20 }
  0x60   :  { %p3102_p4 = por %p3101_p3, %p3100_p2 }
  0x62   :  { %p3103_p5 = pnand %p3102_p4, %p3096_p1 }
  0x64   :  { %3106 = shalt.err (!%p3103_p5)
}
  0x65   :  { %100 = dma.hbm_to_vmem [thread:$0]  %s3787_s9, 1024, %s95_s30, [#allocation13], %s3144_s18, %s3144_s18, %s3145_s24  }
  0x66   :  { %3129 = dma.done.wait [#allocation4], 256  }
  0x67   :  { %3130 = vsyncadd [#allocation4], 4294967040 }
  0x68   :  { %3131 = dma.done.wait [#allocation7], 1536  }
  0x69   :  { %3132 = vsyncadd [#allocation7], 4294965760 }
  0x6a   :  { %3133 = dma.done.wait [#allocation10], 2048  }
  0x6b   :  { %3134 = vsyncadd [#allocation10], 4294965248 }
  0x6c   :  { %3135 = dma.done.wait [#allocation13], 1024  }
  0x6d   :  { %3136 = vsyncadd [#allocation13], 4294966272  ;;  %v3149_v0 = vmov 0.0   ;;  %vm3150_vm0 = vmmov 0   ;;  %v2879_v1 = vld [vmem:[#allocation9] sm:$0xff]   ;;  %v2880_v2 = vld [vmem:[#allocation9 + $0x8] sm:$0xff]  }
  0x6e   :  { %2588 = vmatprep.subr.bf16.mxu0 %v3149_v0  ;;  %2604 = vmatprep.mubr.msk.bf16.mxu0 %vm3150_vm0, %v3149_v0  ;;  %v2881_v3 = vld [vmem:[#allocation8] sm:$0xff]   ;;  %v2882_v4 = vld [vmem:[#allocation9 + $0x10] sm:$0xff]   ;;  %v2883_v5 = vld [vmem:[#allocation8 + $0x8] sm:$0xff]   ;;  %vm507_vm1 = vcmask 130048   ;;  %s3154_s22 = smov 48   ;;  %s3155_s29 = smov 32  }
  0x6f   :  { %2608 = vmatprep.subr.bf16.mxu1 %v2879_v1  ;;  %2589 = vmatpush3.bf16.msra.mxu0 %v2881_v3  ;;  %v2884_v6 = vld [vmem:[#allocation9 + $0x18] sm:$0xff]   ;;  %v2885_v7 = vld [vmem:[#allocation8 + $0x10] sm:$0xff]   ;;  %v2886_v8 = vld [vmem:[#allocation9 + $0x20] sm:$0xff]   ;;  %s3156_s30 = smov 16   ;;  %vm937_vm2 = vcmask 261248   ;;  %vm1160_vm3 = vcmask 392448  }
  0x70   :  { %2609 = vmatpush3.bf16.msra.mxu1 %v2879_v1  ;;  %2590 = vmatprep.subr.bf16.mxu0 %v3149_v0  ;;  %v2887_v9 = vld [vmem:[#allocation8 + $0x18] sm:$0xff]   ;;  %v125_v10 = vld [vmem:[#allocation6] sm:$0xff]  ;;  %v126_v11 = vld [vmem:[#allocation6 + $0x8] sm:$0xff]  ;;  %vm1383_vm4 = vcmask 523648   ;;  %vm1606_vm5 = vcmask 654848   ;;  %vm1829_vm6 = vcmask 786048  }
  0x71   :  { %2610 = vmatprep.subr.bf16.mxu1 %v2880_v2  ;;  %v2888_v12 = vld [vmem:[#allocation9 + $0x28] sm:$0xff]   ;;  %v129_v13 = vpack.c.bf16 %v126_v11, %v125_v10  ;;  %v2889_v14 = vld [vmem:[#allocation8 + $0x20] sm:$0xff]   ;;  %v2890_v15 = vld [vmem:[#allocation9 + $0x30] sm:$0xff]   ;;  %vm2052_vm7 = vcmask 917248   ;;  %vm2275_vm8 = vcmask 1048448   ;;  %s3157_s14 = smov [#allocation14]  }
  0x72   :  { %v2891_v16 = vld [vmem:[#allocation8 + $0x28] sm:$0xff]   ;;  %v2892_v17 = vld [vmem:[#allocation9 + $0x38] sm:$0xff]   ;;  %v2893_v18 = vld [vmem:[#allocation8 + $0x30] sm:$0xff]   ;;  %s2397_s16 = sshll.u32 %s3157_s14, 4  ;;  %s2398_s16 = int_to_ptr.vmem [resolvable:$true] %s2397_s16 }
  0x73   :  { %2591 = vmatpush3.bf16.msra.mxu0 %v2883_v5  ;;  %2624 = vmatprep.mubr.bf16.mxu1 %v129_v13  ;;  %v127_v19 = vld [vmem:[#allocation6 + $0x10] sm:$0xff]  ;;  %v128_v20 = vld [vmem:[#allocation6 + $0x18] sm:$0xff]  ;;  %v2895_v26 = vld [vmem:[#allocation11] sm:$0xff]   ;;  %s3107_s0 = scalar_lea.vmem %s2398_s16, 256  ;;  %p3112_p7 = scmp.lt.s32.totalorder %s2398_s16, %s2398_s16 }
  0x74   :  { %2611 = vmatpush3.bf16.msra.mxu1 %v2880_v2  ;;  %2592 = vmatprep.subr.bf16.mxu0 %v3149_v0  ;;  %v2894_v21 = vld [vmem:[#allocation8 + $0x38] sm:$0xff]   ;;  %v122_v22 = vld [vmem:[#allocation3] sm:$0xff]  ;;  %v3318_v24 = vpack.c.bf16 %v128_v20, %v127_v19  ;;  %v2421_v28 = vld [vmem:[%s3784_s6] ss:$0 sm:$0xff]  ;;  %p3108_p6 = scmp.ne.s32.totalorder %s2398_s16, %s3107_s0  ;;  %p3113_p8 = scmp.lt.s32.totalorder %s3107_s0, %s3107_s0 }
  0x75   :  { %2612 = vmatprep.subr.bf16.mxu1 %v2882_v4  ;;  %v123_v23 = vld [vmem:[#allocation3 + $0x8] sm:$0xff]  ;;  %v2412_v30 = vld [vmem:[%s3782_s4] ss:$0 sm:$0xff]  ;;  %v2897_v35 = vld [vmem:[#allocation11 + $0x10] sm:$0xff]   ;;  %s3151_s4 = smov 112  }
  0x76   :  { %v124_v25 = vpack.c.bf16 %v123_v23, %v122_v22  ;;  %v2896_v34 = vld [vmem:[#allocation11 + $0x8] sm:$0xff]   ;;  %v2898_v46 = vld [vmem:[#allocation11 + $0x18] sm:$0xff]   ;;  %v2899_v50 = vld [vmem:[#allocation11 + $0x20] sm:$0xff]   ;;  %p3114_p9 = por %p3113_p8, %p3112_p7 }
  0x77   :  { %2593 = vmatpush3.bf16.msra.mxu0 %v2885_v7  ;;  %v2900_v52 = vld [vmem:[#allocation11 + $0x28] sm:$0xff]   ;;  %v2901_v54 = vld [vmem:[#allocation11 + $0x30] sm:$0xff]   ;;  %v2902_v55 = vld [vmem:[#allocation11 + $0x38] sm:$0xff]  }
  0x78   :  { %2613 = vmatpush3.bf16.msra.mxu1 %v2882_v4  ;;  %2594 = vmatprep.subr.bf16.mxu0 %v3149_v0  ;;  %v3365_v56 = vld [vmem:[%s3780_s2] ss:$0 sm:$0xff]  ;;  %v3372_v63 = vld [vmem:[%s3780_s2 + $0x1] ss:$0 sm:$0xff]  ;;  %s3152_s2 = smov 96   ;;  %p3115_p10 = pnand %p3114_p9, %p3108_p6 }
  0x79   :  { %2614 = vmatprep.subr.bf16.mxu1 %v2884_v6 }
  0x7b   :  { %2595 = vmatpush3.bf16.msra.mxu0 %v2887_v9  ;;  %v2430_v9 = vld [vmem:[%s3786_s8] ss:$0 sm:$0xff]  ;;  %s3153_s8 = smov 80  }
  0x7c   :  { %2615 = vmatpush3.bf16.msra.mxu1 %v2884_v6  ;;  %2596 = vmatprep.subr.bf16.mxu0 %v3149_v0 }
  0x7d   :  { %2616 = vmatprep.subr.bf16.mxu1 %v2886_v8 }
  0x7f   :  { %2597 = vmatpush3.bf16.msra.mxu0 %v2889_v14 }
  0x80   :  { %2617 = vmatpush3.bf16.msra.mxu1 %v2886_v8  ;;  %2598 = vmatprep.subr.bf16.mxu0 %v3149_v0 }
  0x81   :  { %2618 = vmatprep.subr.bf16.mxu1 %v2888_v12 }
  0x83   :  { %2599 = vmatpush3.bf16.msra.mxu0 %v2891_v16 }
  0x84   :  { %2619 = vmatpush3.bf16.msra.mxu1 %v2888_v12  ;;  %2600 = vmatprep.subr.bf16.mxu0 %v3149_v0 }
  0x85   :  { %2620 = vmatprep.subr.bf16.mxu1 %v2890_v15 }
  0x87   :  { %2601 = vmatpush3.bf16.msra.mxu0 %v2893_v18 }
  0x88   :  { %2621 = vmatpush3.bf16.msra.mxu1 %v2890_v15  ;;  %2602 = vmatprep.subr.bf16.mxu0 %v3149_v0 }
  0x89   :  { %2622 = vmatprep.subr.bf16.mxu1 %v2892_v17 }
  0x8b   :  { %2603 = vmatpush3.bf16.msra.mxu0 %v2894_v21 }
  0x8c   :  { %2623 = vmatpush3.bf16.msra.mxu1 %v2892_v17  ;;  %2628 = vmatprep.subr.bf16.mxu0 %v2895_v26 }
  0x8d   :  { %2648 = vmatprep.subr.bf16.mxu1 %v3149_v0 }
  0x8e   :  { %2605 = vmatmul.mubr.bf16.vlgmr.msra.gmra.mrb[0].mxu0 %v124_v25 }
  0x8f   :  { %2625 = vmatmul.mubr.bf16.vlgmr.msra.gmra.mrb[0].mxu1 %v3318_v24  ;;  %2644 = vmatprep.mubr.bf16.mxu0 %v129_v13 }
  0x90   :  { %2650 = vmatprep.mubr.msk.bf16.mxu1 %vm3150_vm0, %v3149_v0  ;;  %2629 = vmatpush3.bf16.msra.mxu0 %v2895_v26 }
  0x91   :  { %2630 = vmatprep.subr.bf16.mxu0 %v2896_v34 }
  0x94   :  { %2631 = vmatpush3.bf16.msra.mxu0 %v2896_v34 }
  0x95   :  { %2632 = vmatprep.subr.bf16.mxu0 %v2897_v35 }
  0x98   :  { %2633 = vmatpush3.bf16.msra.mxu0 %v2897_v35 }
  0x99   :  { %2634 = vmatprep.subr.bf16.mxu0 %v2898_v46 }
  0x9c   :  { %2635 = vmatpush3.bf16.msra.mxu0 %v2898_v46 }
  0x9d   :  { %2636 = vmatprep.subr.bf16.mxu0 %v2899_v50 }
  0xa0   :  { %2637 = vmatpush3.bf16.msra.mxu0 %v2899_v50 }
  0xa1   :  { %2638 = vmatprep.subr.bf16.mxu0 %v2900_v52 }
  0xa4   :  { %2639 = vmatpush3.bf16.msra.mxu0 %v2900_v52 }
  0xa5   :  { %2640 = vmatprep.subr.bf16.mxu0 %v2901_v54 }
  0xa8   :  { %2641 = vmatpush3.bf16.msra.mxu0 %v2901_v54 }
  0xa9   :  { %2642 = vmatprep.subr.bf16.mxu0 %v2902_v55 }
  0xac   :  { %2643 = vmatpush3.bf16.msra.mxu0 %v2902_v55 }
  0xad   :  { %2696 = vmatprep.subr.bf16.mxu0 %v3149_v0 }
  0xaf   :  { %2645 = vmatmul.mubr.bf16.vlgmr.msra.gmra.mrb[4].mxu0 %v3318_v24 }
  0xb0   :  { %2698 = vmatprep.mubr.msk.bf16.mxu0 %vm3150_vm0, %v3149_v0 }
 0x161   :  { %v236_v31 = vpop.f32.mrb[0].mxu0 }
 0x162   :  { %v2626_v27 = vpop.f32.mrb[0].mxu1  ;;  %v2606_v33 = vpop.f32.mrb[1].mxu0  ;;  %v237_v42 = vadd.f32 %v2412_v30, %v236_v31 }
 0x163   :  { %v349_v29 = vpop.f32.mrb[1].mxu1  ;;  %v358_v36 = vadd.f32 %v2626_v27, %v2421_v28  ;;  %v239_v39 = vpop.f32.mrb[2].mxu0 }
 0x164   :  { %v2627_v32 = vpop.f32.mrb[2].mxu1  ;;  %v350_v40 = vadd.f32 %v2421_v28, %v349_v29  ;;  %v2607_v43 = vpop.f32.mrb[3].mxu0  ;;  %v3334_v47 = vpack.c.bf16 %v237_v42, %v237_v42  ;;  %v240_v49 = vadd.f32 %v2412_v30, %v239_v39 }
 0x165   :  { %v361_v37 = vadd.f32 %v2627_v32, %v2421_v28  ;;  %v352_v38 = vpop.f32.mrb[3].mxu1 }
 0x166   :  { %v353_v41 = vadd.f32 %v2421_v28, %v352_v38  ;;  %v3341_v51 = vpack.c.bf16 %v240_v49, %v240_v49 }
 0x167   :  { %v3330_v44 = vpack.c.bf16 %v361_v37, %v358_v36 }
 0x168   :  { %v3332_v45 = vpack.c.bf16 %v353_v41, %v350_v40 }
 0x169   :  { %v558_v53 = vsel %vm507_vm1, %v3330_v44, 0 }
 0x16a   :  { %715 = vrot.lane.b32.xlu1 %v3332_v45, %s3151_s4  ;;  %v512_v48 = vsel %vm507_vm1, %v3332_v45, 0 }
 0x16b   :  { %2649 = vmatpush3.bf16.xpose.msra.mxu1 %v512_v48 }
 0x16c   :  { %2654 = vmatprep.subr.bf16.mxu1 %v3149_v0 }
 0x16e   :  { %712 = vrot.lane.b32.xlu1 %v3334_v47, %s3151_s4 }
 0x172   :  { %2651 = vmatmul.mubr.msk.bf16.vlgmr.msra.gmra.mrb[4].mxu1 %vm507_vm1, %v3334_v47  ;;  %763 = vrot.lane.b32.xlu1 %v3341_v51, %s3151_s4 }
 0x173   :  { %2655 = vmatpush3.bf16.xpose.msra.mxu1 %v558_v53  ;;  %2656 = vmatprep.mubr.msk.bf16.mxu1 %vm3150_vm0, %v3149_v0 }
 0x174   :  { %2660 = vmatprep.subr.bf16.mxu1 %v3149_v0 }
 0x17a   :  { %2657 = vmatmul.mubr.msk.bf16.vlgmr.msra.gmra.mrb[8].mxu1 %vm507_vm1, %v3341_v51 }
 0x17b   :  { %2662 = vmatprep.mubr.msk.bf16.mxu1 %vm3150_vm0, %v3149_v0 }
 0x182   :  { %v2646_v7 = vpop.f32.mrb[4].mxu0 }
 0x183   :  { %v471_v8 = vpop.f32.mrb[5].mxu0  ;;  %v480_v11 = vadd.f32 %v2646_v7, %v2430_v9 }
 0x184   :  { %v2647_v10 = vpop.f32.mrb[6].mxu0  ;;  %v472_v12 = vadd.f32 %v2430_v9, %v471_v8 }
 0x185   :  { %v483_v13 = vadd.f32 %v2647_v10, %v2430_v9  ;;  %v474_v14 = vpop.f32.mrb[7].mxu0 }
 0x186   :  { %v475_v15 = vadd.f32 %v2430_v9, %v474_v14 }
 0x187   :  { %v3379_v16 = vpack.c.bf16 %v483_v13, %v480_v11 }
 0x188   :  { %v3381_v17 = vpack.c.bf16 %v475_v15, %v472_v12 }
 0x18a   :  { %835 = vrot.lane.b32.xlu1 %v3381_v17, %s3151_s4  ;;  %2661 = vmatpush3.bf16.msra.mxu1 %v3381_v17 }
 0x18b   :  { %2666 = vmatprep.subr.bf16.mxu1 %v3149_v0 }
 0x1dc   :  { %v716_v27 = vpop.permute.xlu1 %715 }
 0x1dd   :  { %v721_v29 = vsel %vm507_vm1, %v716_v27, 0 }
 0x1e0   :  { %v713_v30 = vpop.permute.xlu1 %712 }
 0x1e4   :  { %v764_v33 = vpop.permute.xlu1 %763 }
 0x1fc   :  { %v836_v34 = vpop.permute.xlu1 %835 }
 0x245   :  { %v548_v57 = vpop.f32.mrb[4].mxu1 }
 0x246   :  { %v549_v58 = vadd.f32 %v3365_v56, %v548_v57  ;;  %v2652_v59 = vpop.f32.mrb[5].mxu1 }
 0x247   :  { %v551_v60 = vpop.f32.mrb[6].mxu1 }
 0x248   :  { %v2653_v61 = vpop.f32.mrb[7].mxu1  ;;  %v600_v62 = vsel %vm507_vm1, %v549_v58, -inf }
 0x249   :  { %601 = vmax.xlane.f32.xlu0 %v600_v62 }
 0x24d   :  { %v594_v1 = vpop.f32.mrb[8].mxu1 }
 0x24e   :  { %v595_v2 = vadd.f32 %v3372_v63, %v594_v1  ;;  %v2658_v3 = vpop.f32.mrb[9].mxu1 }
 0x24f   :  { %v597_v4 = vpop.f32.mrb[10].mxu1 }
 0x250   :  { %v2659_v5 = vpop.f32.mrb[11].mxu1  ;;  %v603_v6 = vsel %vm507_vm1, %v595_v2, -inf }
 0x251   :  { %604 = vmax.xlane.f32.xlu0 %v603_v6 }
 0x267   :  { %766 = vrot.lane.b32.xlu0 %v3330_v44, %s3151_s4 }
 0x2d6   :  { %v602_v18 = vpop.xlane.xlu0 %601 }
 0x2d7   :  { %v606_v19 = vsub.f32 %v549_v58, %v602_v18 }
 0x2d9   :  { %v608_v20 = vmul.f32 1.442695, %v606_v19 }
 0x2db   :  { %2911 = vpow2.f32 %v608_v20 }
 0x2de   :  { %v605_v21 = vpop.xlane.xlu0 %604 }
 0x2df   :  { %v607_v22 = vsub.f32 %v595_v2, %v605_v21 }
 0x2e1   :  { %v610_v23 = vmul.f32 1.442695, %v607_v22 }
 0x2e2   :  { %v767_v31 = vpop.permute.xlu0 %766 }
 0x2e3   :  { %2913 = vpow2.f32 %v610_v23  ;;  %v772_v32 = vsel %vm507_vm1, %v767_v31, 0 }
 0x2e5   :  { %v3389_v24 = vpop.eup %2911 }
 0x2e6   :  { %v618_v25 = vpack.c.bf16 %v3389_v24, %v3389_v24 }
 0x2e8   :  { %2663 = vmatmul.mubr.msk.bf16.vlgmr.msra.gmra.mrb[12].mxu1 %vm507_vm1, %v618_v25 }
 0x2e9   :  { %2667 = vmatpush3.bf16.msra.mxu1 %v3379_v16  ;;  %2668 = vmatprep.mubr.msk.bf16.mxu1 %vm3150_vm0, %v3149_v0 }
 0x2ea   :  { %2672 = vmatprep.subr.bf16.mxu1 %v3149_v0 }
 0x2ed   :  { %v3398_v26 = vpop.eup %2913 }
 0x2ee   :  { %v619_v28 = vpack.c.bf16 %v3398_v26, %v3398_v26 }
 0x2f0   :  { %2669 = vmatmul.mubr.msk.bf16.vlgmr.msra.gmra.mrb[16].mxu1 %vm507_vm1, %v619_v28 }
 0x2f1   :  { %2674 = vmatprep.mubr.msk.bf16.mxu1 %vm3150_vm0, %v3149_v0 }
 0x2f2   :  { %2673 = vmatpush3.bf16.xpose.msra.mxu1 %v721_v29 }
 0x2f3   :  { %2678 = vmatprep.subr.bf16.mxu1 %v3149_v0 }
 0x2f9   :  { %2675 = vmatmul.mubr.msk.bf16.vlgmr.msra.gmra.mrb[20].mxu1 %vm507_vm1, %v713_v30 }
 0x2fa   :  { %2679 = vmatpush3.bf16.xpose.msra.mxu1 %v772_v32  ;;  %2680 = vmatprep.mubr.msk.bf16.mxu1 %vm3150_vm0, %v3149_v0 }
 0x2fb   :  { %2684 = vmatprep.subr.bf16.mxu1 %v3149_v0 }
 0x301   :  { %2681 = vmatmul.mubr.msk.bf16.vlgmr.msra.gmra.mrb[24].mxu1 %vm507_vm1, %v764_v33 }
 0x302   :  { %2685 = vmatpush3.bf16.msra.mxu1 %v836_v34  ;;  %2686 = vmatprep.mubr.msk.bf16.mxu1 %vm3150_vm0, %v3149_v0 }
 0x303   :  { %2690 = vmatprep.subr.bf16.mxu1 %v3149_v0 }
 0x3bb   :  { %v3416_v35 = vpop.f32.mrb[12].mxu1 }
 0x3bc   :  { %v2664_v36 = vpop.f32.mrb[13].mxu1 }
 0x3bd   :  { %v660_v37 = vpop.f32.mrb[14].mxu1 }
 0x3be   :  { %v2665_v38 = vpop.f32.mrb[15].mxu1 }
 0x3c3   :  { %v3418_v39 = vpop.f32.mrb[16].mxu1 }
 0x3c4   :  { %v2670_v40 = vpop.f32.mrb[17].mxu1 }
 0x3c5   :  { %v703_v41 = vpop.f32.mrb[18].mxu1 }
 0x3c6   :  { %v2671_v42 = vpop.f32.mrb[19].mxu1 }
 0x3cc   :  { %v757_v43 = vpop.f32.mrb[20].mxu1 }
 0x3cd   :  { %v758_v46 = vadd.f32 %v3365_v56, %v757_v43  ;;  %v2676_v48 = vpop.f32.mrb[21].mxu1 }
 0x3ce   :  { %v760_v49 = vpop.f32.mrb[22].mxu1 }
 0x3cf   :  { %v2677_v50 = vpop.f32.mrb[23].mxu1  ;;  %v814_v52 = vsel %vm507_vm1, %v758_v46, -inf }
 0x3d0   :  { %815 = vmax.xlane.f32.xlu1 %v814_v52 }
 0x3d4   :  { %v808_v53 = vpop.f32.mrb[24].mxu1 }
 0x3d5   :  { %v809_v54 = vadd.f32 %v3372_v63, %v808_v53  ;;  %v2682_v55 = vpop.f32.mrb[25].mxu1 }
 0x3d6   :  { %v811_v57 = vpop.f32.mrb[26].mxu1 }
 0x3d7   :  { %v2683_v58 = vpop.f32.mrb[27].mxu1  ;;  %v817_v59 = vsel %vm507_vm1, %v809_v54, -inf }
 0x3d8   :  { %818 = vmax.xlane.f32.xlu0 %v817_v59 }
 0x3e1   :  { %941 = vrot.lane.b32.xlu1 %v3332_v45, %s3152_s2 }
 0x3e5   :  { %991 = vrot.lane.b32.xlu1 %v3330_v44, %s3152_s2 }
 0x3e9   :  { %939 = vrot.lane.b32.xlu1 %v3334_v47, %s3152_s2 }
 0x3ed   :  { %989 = vrot.lane.b32.xlu1 %v3341_v51, %s3152_s2 }
 0x3ee   :  { %882 = vrot.lane.b32.xlu0 %v3379_v16, %s3151_s4 }
 0x3f2   :  { %1059 = vrot.lane.b32.xlu0 %v3381_v17, %s3152_s2 }
 0x45d   :  { %v816_v60 = vpop.xlane.xlu1 %815 }
 0x45e   :  { %v820_v61 = vsub.f32 %v758_v46, %v816_v60 }
 0x460   :  { %v822_v62 = vmul.f32 1.442695, %v820_v61 }
 0x461   :  { %v942_v1 = vpop.permute.xlu1 %941 }
 0x462   :  { %2915 = vpow2.f32 %v822_v62  ;;  %v947_v2 = vsel %vm507_vm1, %v942_v1, 0 }
 0x463   :  { %2697 = vmatpush3.bf16.xpose.msra.mxu0 %v947_v2 }
 0x464   :  { %2708 = vmatprep.subr.bf16.mxu0 %v3149_v0 }
 0x465   :  { %v992_v3 = vpop.permute.xlu1 %991  ;;  %v819_v4 = vpop.xlane.xlu0 %818 }
 0x466   :  { %v821_v5 = vsub.f32 %v809_v54, %v819_v4  ;;  %v997_v14 = vsel %vm507_vm1, %v992_v3, 0 }
 0x468   :  { %v824_v6 = vmul.f32 1.442695, %v821_v5 }
 0x469   :  { %v940_v7 = vpop.permute.xlu1 %939  ;;  %v883_v8 = vpop.permute.xlu0 %882 }
 0x46a   :  { %2917 = vpow2.f32 %v824_v6  ;;  %2699 = vmatmul.mubr.msk.bf16.vlgmr.msra.gmra.mrb[8].mxu0 %vm507_vm1, %v940_v7 }
 0x46b   :  { %2710 = vmatprep.mubr.msk.bf16.mxu0 %vm3150_vm0, %v3149_v0 }
 0x46c   :  { %v3441_v9 = vpop.eup %2915 }
 0x46d   :  { %v1060_v10 = vpop.permute.xlu0 %1059  ;;  %v832_v11 = vpack.c.bf16 %v3441_v9, %v3441_v9  ;;  %v990_v15 = vpop.permute.xlu1 %989 }
 0x46e   :  { %2709 = vmatpush3.bf16.msra.mxu0 %v1060_v10 }
 0x46f   :  { %2687 = vmatmul.mubr.msk.bf16.vlgmr.msra.gmra.mrb[28].mxu1 %vm507_vm1, %v832_v11  ;;  %2720 = vmatprep.subr.bf16.mxu0 %v3149_v0 }
 0x470   :  { %2691 = vmatpush3.bf16.msra.mxu1 %v883_v8  ;;  %2692 = vmatprep.mubr.msk.bf16.mxu1 %vm3150_vm0, %v3149_v0 }
 0x471   :  { %2702 = vmatprep.subr.bf16.mxu1 %v3149_v0 }
 0x474   :  { %v3450_v12 = vpop.eup %2917 }
 0x475   :  { %v833_v13 = vpack.c.bf16 %v3450_v12, %v3450_v12 }
 0x477   :  { %2693 = vmatmul.mubr.msk.bf16.vlgmr.msra.gmra.mrb[32].mxu1 %vm507_vm1, %v833_v13 }
 0x478   :  { %2704 = vmatprep.mubr.msk.bf16.mxu1 %vm3150_vm0, %v3149_v0 }
 0x479   :  { %2703 = vmatpush3.bf16.xpose.msra.mxu1 %v997_v14 }
 0x47a   :  { %2714 = vmatprep.subr.bf16.mxu1 %v3149_v0 }
 0x480   :  { %2705 = vmatmul.mubr.msk.bf16.vlgmr.msra.gmra.mrb[36].mxu1 %vm507_vm1, %v990_v15 }
 0x481   :  { %2716 = vmatprep.mubr.msk.bf16.mxu1 %vm3150_vm0, %v3149_v0 }
 0x53d   :  { %v983_v18 = vpop.f32.mrb[8].mxu0 }
 0x53e   :  { %v984_v19 = vadd.f32 %v3365_v56, %v983_v18  ;;  %v2700_v20 = vpop.f32.mrb[9].mxu0 }
 0x53f   :  { %v986_v21 = vpop.f32.mrb[10].mxu0 }
 0x540   :  { %v2701_v22 = vpop.f32.mrb[11].mxu0  ;;  %v1039_v23 = vsel %vm507_vm1, %v984_v19, -inf }
 0x541   :  { %1040 = vmax.xlane.f32.xlu1 %v1039_v23 }
 0x542   :  { %v3464_v25 = vpop.f32.mrb[28].mxu1 }
 0x543   :  { %v2688_v27 = vpop.f32.mrb[29].mxu1 }
 0x544   :  { %v878_v28 = vpop.f32.mrb[30].mxu1 }
 0x545   :  { %v2689_v29 = vpop.f32.mrb[31].mxu1 }
 0x54a   :  { %v3466_v30 = vpop.f32.mrb[32].mxu1 }
 0x54b   :  { %v2694_v31 = vpop.f32.mrb[33].mxu1 }
 0x54c   :  { %v925_v32 = vpop.f32.mrb[34].mxu1 }
 0x54d   :  { %v2695_v33 = vpop.f32.mrb[35].mxu1 }
 0x552   :  { %1105 = vrot.lane.b32.xlu1 %v3379_v16, %s3152_s2 }
 0x553   :  { %v1033_v34 = vpop.f32.mrb[36].mxu1 }
 0x554   :  { %v1034_v36 = vadd.f32 %v3372_v63, %v1033_v34  ;;  %v2706_v37 = vpop.f32.mrb[37].mxu1 }
 0x555   :  { %v1036_v38 = vpop.f32.mrb[38].mxu1 }
 0x556   :  { %v2707_v40 = vpop.f32.mrb[39].mxu1  ;;  %1164 = vrot.lane.b32.xlu1 %v3332_v45, %s3153_s8  ;;  %v1042_v41 = vsel %vm507_vm1, %v1034_v36, -inf }
 0x557   :  { %1043 = vmax.xlane.f32.xlu0 %v1042_v41 }
 0x55a   :  { %1162 = vrot.lane.b32.xlu1 %v3334_v47, %s3153_s8 }
 0x56d   :  { %1214 = vrot.lane.b32.xlu0 %v3330_v44, %s3153_s8 }
 0x571   :  { %1212 = vrot.lane.b32.xlu0 %v3341_v51, %s3153_s8 }
 0x575   :  { %1282 = vrot.lane.b32.xlu0 %v3381_v17, %s3153_s8 }
 0x5ce   :  { %v1041_v42 = vpop.xlane.xlu1 %1040 }
 0x5cf   :  { %v1045_v43 = vsub.f32 %v984_v19, %v1041_v42 }
 0x5d1   :  { %v1047_v46 = vmul.f32 1.442695, %v1045_v43 }
 0x5d2   :  { %v1106_v48 = vpop.permute.xlu1 %1105 }
 0x5d3   :  { %2919 = vpow2.f32 %v1047_v46  ;;  %2715 = vmatpush3.bf16.msra.mxu1 %v1106_v48 }
 0x5d4   :  { %2726 = vmatprep.subr.bf16.mxu1 %v3149_v0 }
 0x5d6   :  { %v1165_v50 = vpop.permute.xlu1 %1164 }
 0x5d7   :  { %v1170_v53 = vsel %vm507_vm1, %v1165_v50, 0 }
 0x5da   :  { %v1163_v57 = vpop.permute.xlu1 %1162 }
 0x5dd   :  { %v3483_v49 = vpop.eup %2919 }
 0x5de   :  { %v1057_v52 = vpack.c.bf16 %v3483_v49, %v3483_v49 }
 0x5e0   :  { %2711 = vmatmul.mubr.msk.bf16.vlgmr.msra.gmra.mrb[12].mxu0 %vm507_vm1, %v1057_v52 }
 0x5e1   :  { %2721 = vmatpush3.bf16.xpose.msra.mxu0 %v1170_v53  ;;  %2722 = vmatprep.mubr.msk.bf16.mxu0 %vm3150_vm0, %v3149_v0 }
 0x5e2   :  { %2732 = vmatprep.subr.bf16.mxu0 %v3149_v0 }
 0x5e4   :  { %v1044_v54 = vpop.xlane.xlu0 %1043 }
 0x5e5   :  { %v1046_v55 = vsub.f32 %v1034_v36, %v1044_v54 }
 0x5e7   :  { %v1049_v58 = vmul.f32 1.442695, %v1046_v55 }
 0x5e8   :  { %v1215_v59 = vpop.permute.xlu0 %1214  ;;  %2723 = vmatmul.mubr.msk.bf16.vlgmr.msra.gmra.mrb[16].mxu0 %vm507_vm1, %v1163_v57 }
 0x5e9   :  { %2921 = vpow2.f32 %v1049_v58  ;;  %2734 = vmatprep.mubr.msk.bf16.mxu0 %vm3150_vm0, %v3149_v0  ;;  %v1220_v2 = vsel %vm507_vm1, %v1215_v59, 0 }
 0x5ec   :  { %v1213_v60 = vpop.permute.xlu0 %1212 }
 0x5f0   :  { %v1283_v61 = vpop.permute.xlu0 %1282 }
 0x5f1   :  { %2733 = vmatpush3.bf16.msra.mxu0 %v1283_v61 }
 0x5f2   :  { %2744 = vmatprep.subr.bf16.mxu0 %v3149_v0 }
 0x5f3   :  { %v3496_v62 = vpop.eup %2921 }
 0x5f4   :  { %v1058_v1 = vpack.c.bf16 %v3496_v62, %v3496_v62 }
 0x5f6   :  { %2717 = vmatmul.mubr.msk.bf16.vlgmr.msra.gmra.mrb[40].mxu1 %vm507_vm1, %v1058_v1 }
 0x5f7   :  { %2727 = vmatpush3.bf16.xpose.msra.mxu1 %v1220_v2  ;;  %2728 = vmatprep.mubr.msk.bf16.mxu1 %vm3150_vm0, %v3149_v0 }
 0x5f8   :  { %2738 = vmatprep.subr.bf16.mxu1 %v3149_v0 }
 0x5fe   :  { %2729 = vmatmul.mubr.msk.bf16.vlgmr.msra.gmra.mrb[44].mxu1 %vm507_vm1, %v1213_v60 }
 0x5ff   :  { %2740 = vmatprep.mubr.msk.bf16.mxu1 %vm3150_vm0, %v3149_v0 }
 0x6b3   :  { %v3508_v3 = vpop.f32.mrb[12].mxu0 }
 0x6b4   :  { %v2712_v4 = vpop.f32.mrb[13].mxu0 }
 0x6b5   :  { %v1102_v5 = vpop.f32.mrb[14].mxu0 }
 0x6b6   :  { %v2713_v6 = vpop.f32.mrb[15].mxu0 }
 0x6bb   :  { %v1206_v7 = vpop.f32.mrb[16].mxu0 }
 0x6bc   :  { %v1207_v8 = vadd.f32 %v3365_v56, %v1206_v7  ;;  %v2724_v10 = vpop.f32.mrb[17].mxu0 }
 0x6bd   :  { %v1209_v11 = vpop.f32.mrb[18].mxu0 }
 0x6be   :  { %v2725_v13 = vpop.f32.mrb[19].mxu0  ;;  %v1262_v14 = vsel %vm507_vm1, %v1207_v8, -inf }
 0x6bf   :  { %1263 = vmax.xlane.f32.xlu1 %v1262_v14 }
 0x6c9   :  { %v3512_v15 = vpop.f32.mrb[40].mxu1 }
 0x6ca   :  { %v2718_v18 = vpop.f32.mrb[41].mxu1 }
 0x6cb   :  { %v1148_v19 = vpop.f32.mrb[42].mxu1 }
 0x6cc   :  { %v2719_v20 = vpop.f32.mrb[43].mxu1 }
 0x6d0   :  { %1328 = vrot.lane.b32.xlu1 %v3379_v16, %s3153_s8 }
 0x6d1   :  { %v1256_v21 = vpop.f32.mrb[44].mxu1 }
 0x6d2   :  { %v1257_v22 = vadd.f32 %v3372_v63, %v1256_v21  ;;  %v2730_v23 = vpop.f32.mrb[45].mxu1 }
 0x6d3   :  { %v1259_v27 = vpop.f32.mrb[46].mxu1 }
 0x6d4   :  { %v2731_v28 = vpop.f32.mrb[47].mxu1  ;;  %1387 = vrot.lane.b32.xlu1 %v3332_v45, %s3144_s18  ;;  %v1265_v29 = vsel %vm507_vm1, %v1257_v22, -inf }
 0x6d5   :  { %1266 = vmax.xlane.f32.xlu0 %v1265_v29 }
 0x6d8   :  { %1385 = vrot.lane.b32.xlu1 %v3334_v47, %s3144_s18 }
 0x6eb   :  { %1437 = vrot.lane.b32.xlu0 %v3330_v44, %s3144_s18 }
 0x6ef   :  { %1435 = vrot.lane.b32.xlu0 %v3341_v51, %s3144_s18 }
 0x6f3   :  { %1505 = vrot.lane.b32.xlu0 %v3381_v17, %s3144_s18 }
 0x74c   :  { %v1264_v31 = vpop.xlane.xlu1 %1263 }
 0x74d   :  { %v1268_v32 = vsub.f32 %v1207_v8, %v1264_v31 }
 0x74f   :  { %v1270_v33 = vmul.f32 1.442695, %v1268_v32 }
 0x750   :  { %v1329_v34 = vpop.permute.xlu1 %1328 }
 0x751   :  { %2923 = vpow2.f32 %v1270_v33  ;;  %2739 = vmatpush3.bf16.msra.mxu1 %v1329_v34 }
 0x752   :  { %2750 = vmatprep.subr.bf16.mxu1 %v3149_v0 }
 0x754   :  { %v1388_v37 = vpop.permute.xlu1 %1387 }
 0x755   :  { %v1393_v40 = vsel %vm507_vm1, %v1388_v37, 0 }
 0x758   :  { %v1386_v43 = vpop.permute.xlu1 %1385 }
 0x75b   :  { %v3529_v36 = vpop.eup %2923 }
 0x75c   :  { %v1280_v38 = vpack.c.bf16 %v3529_v36, %v3529_v36 }
 0x75e   :  { %2735 = vmatmul.mubr.msk.bf16.vlgmr.msra.gmra.mrb[20].mxu0 %vm507_vm1, %v1280_v38 }
 0x75f   :  { %2745 = vmatpush3.bf16.xpose.msra.mxu0 %v1393_v40  ;;  %2746 = vmatprep.mubr.msk.bf16.mxu0 %vm3150_vm0, %v3149_v0 }
 0x760   :  { %2756 = vmatprep.subr.bf16.mxu0 %v3149_v0 }
 0x762   :  { %v1267_v41 = vpop.xlane.xlu0 %1266 }
 0x763   :  { %v1269_v42 = vsub.f32 %v1257_v22, %v1267_v41 }
 0x765   :  { %v1272_v46 = vmul.f32 1.442695, %v1269_v42 }
 0x766   :  { %v1438_v48 = vpop.permute.xlu0 %1437  ;;  %2747 = vmatmul.mubr.msk.bf16.vlgmr.msra.gmra.mrb[24].mxu0 %vm507_vm1, %v1386_v43 }
 0x767   :  { %2925 = vpow2.f32 %v1272_v46  ;;  %2758 = vmatprep.mubr.msk.bf16.mxu0 %vm3150_vm0, %v3149_v0  ;;  %v1443_v55 = vsel %vm507_vm1, %v1438_v48, 0 }
 0x76a   :  { %v1436_v50 = vpop.permute.xlu0 %1435 }
 0x76e   :  { %v1506_v52 = vpop.permute.xlu0 %1505 }
 0x76f   :  { %2757 = vmatpush3.bf16.msra.mxu0 %v1506_v52 }
 0x770   :  { %2768 = vmatprep.subr.bf16.mxu0 %v3149_v0 }
 0x771   :  { %v3542_v53 = vpop.eup %2925 }
 0x772   :  { %v1281_v54 = vpack.c.bf16 %v3542_v53, %v3542_v53 }
 0x774   :  { %2741 = vmatmul.mubr.msk.bf16.vlgmr.msra.gmra.mrb[48].mxu1 %vm507_vm1, %v1281_v54 }
 0x775   :  { %2751 = vmatpush3.bf16.xpose.msra.mxu1 %v1443_v55  ;;  %2752 = vmatprep.mubr.msk.bf16.mxu1 %vm3150_vm0, %v3149_v0 }
 0x776   :  { %2762 = vmatprep.subr.bf16.mxu1 %v3149_v0 }
 0x77c   :  { %2753 = vmatmul.mubr.msk.bf16.vlgmr.msra.gmra.mrb[52].mxu1 %vm507_vm1, %v1436_v50 }
 0x77d   :  { %2764 = vmatprep.mubr.msk.bf16.mxu1 %vm3150_vm0, %v3149_v0 }
 0x831   :  { %v3554_v57 = vpop.f32.mrb[20].mxu0 }
 0x832   :  { %v2736_v58 = vpop.f32.mrb[21].mxu0 }
 0x833   :  { %v1325_v59 = vpop.f32.mrb[22].mxu0 }
 0x834   :  { %v2737_v60 = vpop.f32.mrb[23].mxu0 }
 0x839   :  { %v1429_v61 = vpop.f32.mrb[24].mxu0 }
 0x83a   :  { %v1430_v1 = vadd.f32 %v3365_v56, %v1429_v61  ;;  %v2748_v2 = vpop.f32.mrb[25].mxu0 }
 0x83b   :  { %v1432_v4 = vpop.f32.mrb[26].mxu0 }
 0x83c   :  { %v2749_v5 = vpop.f32.mrb[27].mxu0  ;;  %v1485_v6 = vsel %vm507_vm1, %v1430_v1, -inf }
 0x83d   :  { %1486 = vmax.xlane.f32.xlu1 %v1485_v6 }
 0x847   :  { %v3558_v7 = vpop.f32.mrb[48].mxu1 }
 0x848   :  { %v2742_v8 = vpop.f32.mrb[49].mxu1 }
 0x849   :  { %v1371_v10 = vpop.f32.mrb[50].mxu1 }
 0x84a   :  { %v2743_v11 = vpop.f32.mrb[51].mxu1 }
 0x84e   :  { %1551 = vrot.lane.b32.xlu1 %v3379_v16, %s3144_s18 }
 0x84f   :  { %v1479_v13 = vpop.f32.mrb[52].mxu1 }
 0x850   :  { %v1480_v14 = vadd.f32 %v3372_v63, %v1479_v13  ;;  %v2754_v18 = vpop.f32.mrb[53].mxu1 }
 0x851   :  { %v1482_v19 = vpop.f32.mrb[54].mxu1 }
 0x852   :  { %v2755_v20 = vpop.f32.mrb[55].mxu1  ;;  %1610 = vrot.lane.b32.xlu1 %v3332_v45, %s3154_s22  ;;  %v1488_v21 = vsel %vm507_vm1, %v1480_v14, -inf }
 0x853   :  { %1489 = vmax.xlane.f32.xlu0 %v1488_v21 }
 0x856   :  { %1608 = vrot.lane.b32.xlu1 %v3334_v47, %s3154_s22 }
 0x869   :  { %1660 = vrot.lane.b32.xlu0 %v3330_v44, %s3154_s22 }
 0x86d   :  { %1658 = vrot.lane.b32.xlu0 %v3341_v51, %s3154_s22 }
 0x871   :  { %1728 = vrot.lane.b32.xlu0 %v3381_v17, %s3154_s22 }
 0x8ca   :  { %v1487_v22 = vpop.xlane.xlu1 %1486 }
 0x8cb   :  { %v1491_v23 = vsub.f32 %v1430_v1, %v1487_v22 }
 0x8cd   :  { %v1493_v27 = vmul.f32 1.442695, %v1491_v23 }
 0x8ce   :  { %v1552_v28 = vpop.permute.xlu1 %1551 }
 0x8cf   :  { %2927 = vpow2.f32 %v1493_v27  ;;  %2763 = vmatpush3.bf16.msra.mxu1 %v1552_v28 }
 0x8d0   :  { %2774 = vmatprep.subr.bf16.mxu1 %v3149_v0 }
 0x8d2   :  { %v1611_v31 = vpop.permute.xlu1 %1610 }
 0x8d3   :  { %v1616_v33 = vsel %vm507_vm1, %v1611_v31, 0 }
 0x8d6   :  { %v1609_v38 = vpop.permute.xlu1 %1608 }
 0x8d9   :  { %v3575_v29 = vpop.eup %2927 }
 0x8da   :  { %v1503_v32 = vpack.c.bf16 %v3575_v29, %v3575_v29 }
 0x8dc   :  { %2759 = vmatmul.mubr.msk.bf16.vlgmr.msra.gmra.mrb[28].mxu0 %vm507_vm1, %v1503_v32 }
 0x8dd   :  { %2769 = vmatpush3.bf16.xpose.msra.mxu0 %v1616_v33  ;;  %2770 = vmatprep.mubr.msk.bf16.mxu0 %vm3150_vm0, %v3149_v0 }
 0x8de   :  { %2780 = vmatprep.subr.bf16.mxu0 %v3149_v0 }
 0x8e0   :  { %v1490_v34 = vpop.xlane.xlu0 %1489 }
 0x8e1   :  { %v1492_v37 = vsub.f32 %v1480_v14, %v1490_v34 }
 0x8e3   :  { %v1495_v40 = vmul.f32 1.442695, %v1492_v37 }
 0x8e4   :  { %v1661_v41 = vpop.permute.xlu0 %1660  ;;  %2771 = vmatmul.mubr.msk.bf16.vlgmr.msra.gmra.mrb[32].mxu0 %vm507_vm1, %v1609_v38 }
 0x8e5   :  { %2929 = vpow2.f32 %v1495_v40  ;;  %2782 = vmatprep.mubr.msk.bf16.mxu0 %vm3150_vm0, %v3149_v0  ;;  %v1666_v50 = vsel %vm507_vm1, %v1661_v41, 0 }
 0x8e8   :  { %v1659_v42 = vpop.permute.xlu0 %1658 }
 0x8ec   :  { %v1729_v43 = vpop.permute.xlu0 %1728 }
 0x8ed   :  { %2781 = vmatpush3.bf16.msra.mxu0 %v1729_v43 }
 0x8ee   :  { %2792 = vmatprep.subr.bf16.mxu0 %v3149_v0 }
 0x8ef   :  { %v3588_v46 = vpop.eup %2929 }
 0x8f0   :  { %v1504_v48 = vpack.c.bf16 %v3588_v46, %v3588_v46 }
 0x8f2   :  { %2765 = vmatmul.mubr.msk.bf16.vlgmr.msra.gmra.mrb[56].mxu1 %vm507_vm1, %v1504_v48 }
 0x8f3   :  { %2775 = vmatpush3.bf16.xpose.msra.mxu1 %v1666_v50  ;;  %2776 = vmatprep.mubr.msk.bf16.mxu1 %vm3150_vm0, %v3149_v0 }
 0x8f4   :  { %2786 = vmatprep.subr.bf16.mxu1 %v3149_v0 }
 0x8fa   :  { %2777 = vmatmul.mubr.msk.bf16.vlgmr.msra.gmra.mrb[60].mxu1 %vm507_vm1, %v1659_v42 }
 0x8fb   :  { %2788 = vmatprep.mubr.msk.bf16.mxu1 %vm3150_vm0, %v3149_v0 }
 0x9af   :  { %v3600_v52 = vpop.f32.mrb[28].mxu0 }
 0x9b0   :  { %v2760_v54 = vpop.f32.mrb[29].mxu0 }
 0x9b1   :  { %v1548_v55 = vpop.f32.mrb[30].mxu0 }
 0x9b2   :  { %v2761_v58 = vpop.f32.mrb[31].mxu0 }
 0x9b7   :  { %v1652_v59 = vpop.f32.mrb[32].mxu0 }
 0x9b8   :  { %v1653_v60 = vadd.f32 %v3365_v56, %v1652_v59  ;;  %v2772_v61 = vpop.f32.mrb[33].mxu0 }
 0x9b9   :  { %v1655_v1 = vpop.f32.mrb[34].mxu0 }
 0x9ba   :  { %v2773_v2 = vpop.f32.mrb[35].mxu0  ;;  %v1708_v4 = vsel %vm507_vm1, %v1653_v60, -inf }
 0x9bb   :  { %1709 = vmax.xlane.f32.xlu1 %v1708_v4 }
 0x9c5   :  { %v3604_v5 = vpop.f32.mrb[56].mxu1 }
 0x9c6   :  { %v2766_v6 = vpop.f32.mrb[57].mxu1 }
 0x9c7   :  { %v1594_v8 = vpop.f32.mrb[58].mxu1 }
 0x9c8   :  { %v2767_v10 = vpop.f32.mrb[59].mxu1 }
 0x9cc   :  { %1774 = vrot.lane.b32.xlu1 %v3379_v16, %s3154_s22 }
 0x9cd   :  { %v1702_v11 = vpop.f32.mrb[60].mxu1 }
 0x9ce   :  { %v1703_v13 = vadd.f32 %v3372_v63, %v1702_v11  ;;  %v2778_v14 = vpop.f32.mrb[61].mxu1 }
 0x9cf   :  { %v1705_v18 = vpop.f32.mrb[62].mxu1 }
 0x9d0   :  { %v2779_v19 = vpop.f32.mrb[63].mxu1  ;;  %1833 = vrot.lane.b32.xlu1 %v3332_v45, %s3155_s29  ;;  %v1711_v20 = vsel %vm507_vm1, %v1703_v13, -inf }
 0x9d1   :  { %1712 = vmax.xlane.f32.xlu0 %v1711_v20 }
 0x9d4   :  { %1831 = vrot.lane.b32.xlu1 %v3334_v47, %s3155_s29 }
 0x9e7   :  { %1883 = vrot.lane.b32.xlu0 %v3330_v44, %s3155_s29 }
 0x9eb   :  { %1881 = vrot.lane.b32.xlu0 %v3341_v51, %s3155_s29 }
 0x9ef   :  { %1951 = vrot.lane.b32.xlu0 %v3381_v17, %s3155_s29 }
 0xa48   :  { %v1710_v21 = vpop.xlane.xlu1 %1709 }
 0xa49   :  { %v1714_v22 = vsub.f32 %v1653_v60, %v1710_v21 }
 0xa4b   :  { %v1716_v23 = vmul.f32 1.442695, %v1714_v22 }
 0xa4c   :  { %v1775_v27 = vpop.permute.xlu1 %1774 }
 0xa4d   :  { %2931 = vpow2.f32 %v1716_v23  ;;  %2787 = vmatpush3.bf16.msra.mxu1 %v1775_v27 }
 0xa4e   :  { %2798 = vmatprep.subr.bf16.mxu1 %v3149_v0 }
 0xa50   :  { %v1834_v31 = vpop.permute.xlu1 %1833 }
 0xa51   :  { %v1839_v33 = vsel %vm507_vm1, %v1834_v31, 0 }
 0xa54   :  { %v1832_v38 = vpop.permute.xlu1 %1831 }
 0xa57   :  { %v3621_v28 = vpop.eup %2931 }
 0xa58   :  { %v1726_v32 = vpack.c.bf16 %v3621_v28, %v3621_v28 }
 0xa5a   :  { %2783 = vmatmul.mubr.msk.bf16.vlgmr.msra.gmra.mrb[36].mxu0 %vm507_vm1, %v1726_v32 }
 0xa5b   :  { %2793 = vmatpush3.bf16.xpose.msra.mxu0 %v1839_v33  ;;  %2794 = vmatprep.mubr.msk.bf16.mxu0 %vm3150_vm0, %v3149_v0 }
 0xa5c   :  { %2804 = vmatprep.subr.bf16.mxu0 %v3149_v0 }
 0xa5e   :  { %v1713_v34 = vpop.xlane.xlu0 %1712 }
 0xa5f   :  { %v1715_v37 = vsub.f32 %v1703_v13, %v1713_v34 }
 0xa61   :  { %v1718_v40 = vmul.f32 1.442695, %v1715_v37 }
 0xa62   :  { %v1884_v41 = vpop.permute.xlu0 %1883  ;;  %2795 = vmatmul.mubr.msk.bf16.vlgmr.msra.gmra.mrb[40].mxu0 %vm507_vm1, %v1832_v38 }
 0xa63   :  { %2933 = vpow2.f32 %v1718_v40  ;;  %2806 = vmatprep.mubr.msk.bf16.mxu0 %vm3150_vm0, %v3149_v0  ;;  %v1889_v54 = vsel %vm507_vm1, %v1884_v41, 0 }
 0xa66   :  { %v1882_v42 = vpop.permute.xlu0 %1881 }
 0xa6a   :  { %v1952_v43 = vpop.permute.xlu0 %1951 }
 0xa6b   :  { %2805 = vmatpush3.bf16.msra.mxu0 %v1952_v43 }
 0xa6c   :  { %2816 = vmatprep.subr.bf16.mxu0 %v3149_v0 }
 0xa6d   :  { %v3634_v48 = vpop.eup %2933 }
 0xa6e   :  { %v1727_v50 = vpack.c.bf16 %v3634_v48, %v3634_v48 }
 0xa70   :  { %2789 = vmatmul.mubr.msk.bf16.vlgmr.msra.gmra.mrb[64].mxu1 %vm507_vm1, %v1727_v50 }
 0xa71   :  { %2799 = vmatpush3.bf16.xpose.msra.mxu1 %v1889_v54  ;;  %2800 = vmatprep.mubr.msk.bf16.mxu1 %vm3150_vm0, %v3149_v0 }
 0xa72   :  { %2810 = vmatprep.subr.bf16.mxu1 %v3149_v0 }
 0xa78   :  { %2801 = vmatmul.mubr.msk.bf16.vlgmr.msra.gmra.mrb[68].mxu1 %vm507_vm1, %v1882_v42 }
 0xa79   :  { %2812 = vmatprep.mubr.msk.bf16.mxu1 %vm3150_vm0, %v3149_v0 }
 0xb2d   :  { %v3646_v55 = vpop.f32.mrb[36].mxu0 }
 0xb2e   :  { %v2784_v58 = vpop.f32.mrb[37].mxu0 }
 0xb2f   :  { %v1771_v59 = vpop.f32.mrb[38].mxu0 }
 0xb30   :  { %v2785_v60 = vpop.f32.mrb[39].mxu0 }
 0xb35   :  { %v1875_v61 = vpop.f32.mrb[40].mxu0 }
 0xb36   :  { %v1876_v1 = vadd.f32 %v3365_v56, %v1875_v61  ;;  %v2796_v2 = vpop.f32.mrb[41].mxu0 }
 0xb37   :  { %v1878_v4 = vpop.f32.mrb[42].mxu0 }
 0xb38   :  { %v2797_v6 = vpop.f32.mrb[43].mxu0  ;;  %v1931_v8 = vsel %vm507_vm1, %v1876_v1, -inf }
 0xb39   :  { %1932 = vmax.xlane.f32.xlu1 %v1931_v8 }
 0xb43   :  { %v3650_v10 = vpop.f32.mrb[64].mxu1 }
 0xb44   :  { %v2790_v11 = vpop.f32.mrb[65].mxu1 }
 0xb45   :  { %v1817_v13 = vpop.f32.mrb[66].mxu1 }
 0xb46   :  { %v2791_v14 = vpop.f32.mrb[67].mxu1 }
 0xb4a   :  { %1997 = vrot.lane.b32.xlu1 %v3379_v16, %s3155_s29 }
 0xb4b   :  { %v1925_v18 = vpop.f32.mrb[68].mxu1 }
 0xb4c   :  { %v1926_v19 = vadd.f32 %v3372_v63, %v1925_v18  ;;  %v2802_v20 = vpop.f32.mrb[69].mxu1 }
 0xb4d   :  { %v1928_v21 = vpop.f32.mrb[70].mxu1 }
 0xb4e   :  { %v2803_v22 = vpop.f32.mrb[71].mxu1  ;;  %2056 = vrot.lane.b32.xlu1 %v3332_v45, %s3156_s30  ;;  %v1934_v23 = vsel %vm507_vm1, %v1926_v19, -inf }
 0xb4f   :  { %1935 = vmax.xlane.f32.xlu0 %v1934_v23 }
 0xb52   :  { %2054 = vrot.lane.b32.xlu1 %v3334_v47, %s3156_s30 }
 0xb65   :  { %2106 = vrot.lane.b32.xlu0 %v3330_v44, %s3156_s30 }
 0xb69   :  { %2104 = vrot.lane.b32.xlu0 %v3341_v51, %s3156_s30 }
 0xbc6   :  { %v1933_v27 = vpop.xlane.xlu1 %1932 }
 0xbc7   :  { %v1937_v31 = vsub.f32 %v1876_v1, %v1933_v27 }
 0xbc9   :  { %v1939_v32 = vmul.f32 1.442695, %v1937_v31  ;;  %v826_v31 = vsel %vm507_vm1, %v3441_v9, 0.0  ;;  %v829_v9 = vsel %vm507_vm1, %v3450_v12, 0.0 }
 0xbca   :  { %v1998_v33 = vpop.permute.xlu1 %1997 }
 0xbcb   :  { %2935 = vpow2.f32 %v1939_v32  ;;  %2811 = vmatpush3.bf16.msra.mxu1 %v1998_v33  ;;  %v1054_v32 = vsel %vm507_vm1, %v3496_v62, 0.0  ;;  %v1723_v33 = vsel %vm507_vm1, %v3634_v48, 0.0  ;;  %v1051_v62 = vsel %vm507_vm1, %v3483_v49, 0.0 }
 0xbcc   :  { %2822 = vmatprep.subr.bf16.mxu1 %v3149_v0  ;;  %v1720_v48 = vsel %vm507_vm1, %v3621_v28, 0.0 }
 0xbce   :  { %v2057_v34 = vpop.permute.xlu1 %2056 }
 0xbcf   :  { %v2062_v37 = vsel %vm507_vm1, %v2057_v34, 0 }
 0xbd2   :  { %v2055_v38 = vpop.permute.xlu1 %2054 }
 0xbd5   :  { %v3665_v45 = vpop.eup %2935 }
 0xbd6   :  { %v1949_v47 = vpack.c.bf16 %v3665_v45, %v3665_v45  ;;  %v1943_v12 = vsel %vm507_vm1, %v3665_v45, 0.0 }
 0xbd8   :  { %2807 = vmatmul.mubr.msk.bf16.vlgmr.msra.gmra.mrb[44].mxu0 %vm507_vm1, %v1949_v47 }
 0xbd9   :  { %2817 = vmatpush3.bf16.xpose.msra.mxu0 %v2062_v37  ;;  %2818 = vmatprep.mubr.msk.bf16.mxu0 %vm3150_vm0, %v3149_v0 }
 0xbda   :  { %2828 = vmatprep.subr.bf16.mxu0 %v3149_v0 }
 0xbdc   :  { %v1936_v44 = vpop.xlane.xlu0 %1935 }
 0xbdd   :  { %v1938_v51 = vsub.f32 %v1926_v19, %v1936_v44 }
 0xbdf   :  { %v1941_v40 = vmul.f32 1.442695, %v1938_v51 }
 0xbe0   :  { %2819 = vmatmul.mubr.msk.bf16.vlgmr.msra.gmra.mrb[48].mxu0 %vm507_vm1, %v2055_v38  ;;  %v2107_v42 = vpop.permute.xlu0 %2106 }
 0xbe1   :  { %2937 = vpow2.f32 %v1941_v40  ;;  %2830 = vmatprep.mubr.msk.bf16.mxu0 %vm3150_vm0, %v3149_v0  ;;  %v2112_v50 = vsel %vm507_vm1, %v2107_v42, 0 }
 0xbe4   :  { %v2105_v54 = vpop.permute.xlu0 %2104 }
 0xbeb   :  { %v2938_v41 = vpop.eup %2937 }
 0xbec   :  { %v1950_v43 = vpack.c.bf16 %v2938_v41, %v2938_v41 }
 0xbee   :  { %2813 = vmatmul.mubr.msk.bf16.vlgmr.msra.gmra.mrb[72].mxu1 %vm507_vm1, %v1950_v43 }
 0xbef   :  { %2823 = vmatpush3.bf16.xpose.msra.mxu1 %v2112_v50  ;;  %2824 = vmatprep.mubr.msk.bf16.mxu1 %vm3150_vm0, %v3149_v0 }
 0xbf0   :  { %2834 = vmatprep.subr.bf16.mxu1 %v3149_v0 }
 0xbf6   :  { %2825 = vmatmul.mubr.msk.bf16.vlgmr.msra.gmra.mrb[76].mxu1 %vm507_vm1, %v2105_v54 }
 0xbf7   :  { %2836 = vmatprep.mubr.msk.bf16.mxu1 %vm3150_vm0, %v3149_v0 }
 0xcab   :  { %v3685_v58 = vpop.f32.mrb[44].mxu0 }
 0xcac   :  { %v2808_v59 = vpop.f32.mrb[45].mxu0 }
 0xcad   :  { %v1994_v60 = vpop.f32.mrb[46].mxu0 }
 0xcae   :  { %v2809_v61 = vpop.f32.mrb[47].mxu0 }
 0xcb3   :  { %v2098_v1 = vpop.f32.mrb[48].mxu0 }
 0xcb4   :  { %v2099_v2 = vadd.f32 %v3365_v56, %v2098_v1  ;;  %v2820_v4 = vpop.f32.mrb[49].mxu0 }
 0xcb5   :  { %v2101_v6 = vpop.f32.mrb[50].mxu0 }
 0xcb6   :  { %v2821_v8 = vpop.f32.mrb[51].mxu0  ;;  %v2154_v11 = vsel %vm507_vm1, %v2099_v2, -inf }
 0xcb7   :  { %2155 = vmax.xlane.f32.xlu1 %v2154_v11 }
 0xcc1   :  { %v3689_v13 = vpop.f32.mrb[72].mxu1 }
 0xcc2   :  { %v2814_v14 = vpop.f32.mrb[73].mxu1 }
 0xcc3   :  { %v2040_v18 = vpop.f32.mrb[74].mxu1 }
 0xcc4   :  { %v2815_v19 = vpop.f32.mrb[75].mxu1 }
 0xcc8   :  { %2220 = vrot.lane.b32.xlu1 %v3379_v16, %s3156_s30  ;;  %v1500_v16 = vsel %vm507_vm1, %v3588_v46, 0.0  ;;  %v1497_v46 = vsel %vm507_vm1, %v3575_v29, 0.0  ;;  %v612_v29 = vsel %vm507_vm1, %v3389_v24, 0.0  ;;  %v615_v24 = vsel %vm507_vm1, %v3398_v26, 0.0 }
 0xcc9   :  { %v2148_v20 = vpop.f32.mrb[76].mxu1 }
 0xcca   :  { %v2149_v21 = vadd.f32 %v3372_v63, %v2148_v20  ;;  %v2826_v22 = vpop.f32.mrb[77].mxu1  ;;  %v1277_v63 = vsel %vm507_vm1, %v3542_v53, 0.0  ;;  %v1274_v53 = vsel %vm507_vm1, %v3529_v36, 0.0 }
 0xccb   :  { %v2151_v23 = vpop.f32.mrb[78].mxu1 }
 0xccc   :  { %v2827_v56 = vpop.f32.mrb[79].mxu1  ;;  %v2157_v27 = vsel %vm507_vm1, %v2149_v21, -inf }
 0xccd   :  { %2158 = vmax.xlane.f32.xlu0 %v2157_v27 }
 0xce3   :  { %2174 = vrot.lane.b32.xlu0 %v3381_v17, %s3156_s30  ;;  %v1946_v17 = vsel %vm507_vm1, %v2938_v41, 0.0 }
 0xcec   :  { %827 = vadd.xlane.f32.xlu1 %v826_v31 }
 0xcf0   :  { %1055 = vadd.xlane.f32.xlu1 %v1054_v32 }
 0xcf4   :  { %1278 = vadd.xlane.f32.xlu1 %v1277_v63 }
 0xcf8   :  { %1501 = vadd.xlane.f32.xlu1 %v1500_v16 }
 0xcfc   :  { %1724 = vadd.xlane.f32.xlu1 %v1723_v33 }
 0xd00   :  { %1947 = vadd.xlane.f32.xlu1 %v1946_v17 }
 0xd02   :  { %830 = vadd.xlane.f32.xlu0 %v829_v9 }
 0xd06   :  { %1052 = vadd.xlane.f32.xlu0 %v1051_v62 }
 0xd0a   :  { %1275 = vadd.xlane.f32.xlu0 %v1274_v53 }
 0xd0e   :  { %1498 = vadd.xlane.f32.xlu0 %v1497_v46 }
 0xd12   :  { %1721 = vadd.xlane.f32.xlu0 %v1720_v48 }
 0xd16   :  { %1944 = vadd.xlane.f32.xlu0 %v1943_v12 }
 0xd44   :  { %v2156_v34 = vpop.xlane.xlu1 %2155 }
 0xd45   :  { %v2160_v47 = vsub.f32 %v2099_v2, %v2156_v34 }
 0xd47   :  { %v2162_v49 = vmul.f32 1.442695, %v2160_v47 }
 0xd48   :  { %v2221_v37 = vpop.permute.xlu1 %2220 }
 0xd49   :  { %2939 = vpow2.f32 %v2162_v49  ;;  %2835 = vmatpush3.bf16.msra.mxu1 %v2221_v37  ;;  %v2904_v49 = vld [vmem:[#allocation12 + $0x8] sm:$0xff]  }
 0xd53   :  { %v2940_v36 = vpop.eup %2939 }
 0xd54   :  { %v2166_v44 = vsel %vm507_vm1, %v2940_v36, 0.0  ;;  %v2172_v45 = vpack.c.bf16 %v2940_v36, %v2940_v36 }
 0xd55   :  { %2167 = vadd.xlane.f32.xlu0 %v2166_v44 }
 0xd59   :  { %613 = vadd.xlane.f32.xlu0 %v612_v29 }
 0xd5a   :  { %v2159_v28 = vpop.xlane.xlu0 %2158 }
 0xd5b   :  { %v2161_v51 = vsub.f32 %v2149_v21, %v2159_v28 }
 0xd5d   :  { %v2164_v38 = vmul.f32 1.442695, %v2161_v51 }
 0xd5e   :  { %v2175_v40 = vpop.permute.xlu0 %2174 }
 0xd5f   :  { %2941 = vpow2.f32 %v2164_v38  ;;  %2829 = vmatpush3.bf16.msra.mxu0 %v2175_v40 }
 0xd60   :  { %2840 = vmatprep.subr.bf16.mxu0 %v3149_v0 }
 0xd62   :  { %2831 = vmatmul.mubr.msk.bf16.vlgmr.msra.gmra.mrb[52].mxu0 %vm507_vm1, %v2172_v45 }
 0xd63   :  { %2856 = vmatprep.mubr.msk.bf16.mxu0 %vm3150_vm0, %v3149_v0 }
 0xd69   :  { %v2942_v41 = vpop.eup %2941 }
 0xd6a   :  { %v2169_v42 = vsel %vm507_vm1, %v2942_v41, 0.0  ;;  %v2173_v43 = vpack.c.bf16 %v2942_v41, %v2942_v41 }
 0xd6b   :  { %2170 = vadd.xlane.f32.xlu1 %v2169_v42 }
 0xd6c   :  { %2837 = vmatmul.mubr.msk.bf16.vlgmr.msra.gmra.mrb[80].mxu1 %vm507_vm1, %v2173_v43 }
 0xd6f   :  { %616 = vadd.xlane.f32.xlu1 %v615_v24 }
 0xd79   :  { %v828_v50 = vpop.xlane.xlu1 %827 }
 0xd7a   :  { %2943 = vrcp.f32 %v828_v50 }
 0xd7d   :  { %v1056_v54 = vpop.xlane.xlu1 %1055 }
 0xd81   :  { %v1279_v59 = vpop.xlane.xlu1 %1278 }
 0xd84   :  { %v2944_v4 = vpop.eup %2943 }
 0xd85   :  { %v1502_v61 = vpop.xlane.xlu1 %1501  ;;  %v930_v26 = vmul.f32 %v2944_v4, %v3464_v25 }
 0xd89   :  { %v1725_v6 = vpop.xlane.xlu1 %1724 }
 0xd8d   :  { %v1948_v21 = vpop.xlane.xlu1 %1947 }
 0xd8f   :  { %v831_v60 = vpop.xlane.xlu0 %830 }
 0xd90   :  { %2945 = vrcp.f32 %v831_v60  ;;  %v2909_v60 = vld [vmem:[#allocation12 + $0x30] sm:$0xff]  }
 0xd91   :  { %2947 = vrcp.f32 %v1056_v54 }
 0xd93   :  { %v1053_v1 = vpop.xlane.xlu0 %1052 }
 0xd94   :  { %2949 = vrcp.f32 %v1053_v1  ;;  %v2910_v1 = vld [vmem:[#allocation12 + $0x38] sm:$0xff]  }
 0xd95   :  { %2951 = vrcp.f32 %v1279_v59 }
 0xd97   :  { %v1276_v2 = vpop.xlane.xlu0 %1275 }
 0xd98   :  { %2953 = vrcp.f32 %v1276_v2 }
 0xd99   :  { %2955 = vrcp.f32 %v1502_v61 }
 0xd9a   :  { %v2946_v8 = vpop.eup %2945 }
 0xd9b   :  { %v1499_v11 = vpop.xlane.xlu0 %1498  ;;  %v931_v14 = vmul.f32 %v2946_v8, %v3466_v30  ;;  %v2948_v18 = vpop.eup %2947 }
 0xd9c   :  { %2957 = vrcp.f32 %v1499_v11  ;;  %v1154_v56 = vmul.f32 %v2948_v18, %v3512_v15 }
 0xd9d   :  { %v932_v19 = vpack.c.bf16 %v931_v14, %v930_v26  ;;  %2959 = vrcp.f32 %v1725_v6 }
 0xd9e   :  { %v2950_v20 = vpop.eup %2949 }
 0xd9f   :  { %934 = vrot.lane.b32.xlu0 %v932_v19, %s3156_s30  ;;  %v1722_v22 = vpop.xlane.xlu0 %1721  ;;  %v1153_v23 = vmul.f32 %v2950_v20, %v3508_v3  ;;  %v2952_v27 = vpop.eup %2951 }
 0xda0   :  { %2961 = vrcp.f32 %v1722_v22  ;;  %v1377_v63 = vmul.f32 %v2952_v27, %v3558_v7 }
 0xda1   :  { %v1155_v31 = vpack.c.bf16 %v1154_v56, %v1153_v23  ;;  %2963 = vrcp.f32 %v1948_v21 }
 0xda2   :  { %v2954_v32 = vpop.eup %2953 }
 0xda3   :  { %1157 = vrot.lane.b32.xlu1 %v1155_v31, %s3155_s29  ;;  %v1945_v25 = vpop.xlane.xlu0 %1944  ;;  %v1376_v30 = vmul.f32 %v2954_v32, %v3554_v57  ;;  %v2956_v16 = vpop.eup %2955 }
 0xda4   :  { %2965 = vrcp.f32 %v1945_v25  ;;  %v1600_v15 = vmul.f32 %v2956_v16, %v3604_v5  ;;  %v2903_v5 = vld [vmem:[#allocation12] sm:$0xff]  }
 0xda5   :  { %v1378_v33 = vpack.c.bf16 %v1377_v63, %v1376_v30  ;;  %2841 = vmatpush3.bf16.msra.mxu0 %v2903_v5 }
 0xda6   :  { %v2958_v17 = vpop.eup %2957  ;;  %2842 = vmatprep.subr.bf16.mxu0 %v3149_v0 }
 0xda7   :  { %1380 = vrot.lane.b32.xlu1 %v1378_v33, %s3154_s22  ;;  %v1599_v3 = vmul.f32 %v2958_v17, %v3600_v52  ;;  %v2960_v9 = vpop.eup %2959 }
 0xda8   :  { %v1823_v57 = vmul.f32 %v2960_v9, %v3650_v10  ;;  %v2906_v10 = vld [vmem:[#allocation12 + $0x18] sm:$0xff]  }
 0xda9   :  { %v1601_v62 = vpack.c.bf16 %v1600_v15, %v1599_v3  ;;  %2843 = vmatpush3.bf16.msra.mxu0 %v2904_v49 }
 0xdaa   :  { %v2962_v53 = vpop.eup %2961  ;;  %2844 = vmatprep.subr.bf16.mxu0 %v3149_v0 }
 0xdab   :  { %1603 = vrot.lane.b32.xlu0 %v1601_v62, %s3144_s18  ;;  %v1822_v46 = vmul.f32 %v2962_v53, %v3646_v55  ;;  %v2964_v7 = vpop.eup %2963  ;;  %v2905_v55 = vld [vmem:[#allocation12 + $0x10] sm:$0xff]  }
 0xdac   :  { %v2046_v52 = vmul.f32 %v2964_v7, %v3689_v13  ;;  %v2908_v13 = vld [vmem:[#allocation12 + $0x28] sm:$0xff]  }
 0xdad   :  { %v1824_v48 = vpack.c.bf16 %v1823_v57, %v1822_v46  ;;  %2845 = vmatpush3.bf16.msra.mxu0 %v2905_v55 }
 0xdae   :  { %v2966_v12 = vpop.eup %2965  ;;  %2846 = vmatprep.subr.bf16.mxu0 %v3149_v0 }
 0xdaf   :  { %1826 = vrot.lane.b32.xlu1 %v1824_v48, %s3153_s8  ;;  %v2045_v34 = vmul.f32 %v2966_v12, %v3685_v58  ;;  %v2907_v58 = vld [vmem:[#allocation12 + $0x20] sm:$0xff]  }
 0xdb1   :  { %v2047_v47 = vpack.c.bf16 %v2046_v52, %v2045_v34  ;;  %2847 = vmatpush3.bf16.msra.mxu0 %v2906_v10 }
 0xdb2   :  { %2848 = vmatprep.subr.bf16.mxu0 %v3149_v0 }
 0xdb3   :  { %2049 = vrot.lane.b32.xlu0 %v2047_v47, %s3152_s2 }
 0xdb5   :  { %2849 = vmatpush3.bf16.msra.mxu0 %v2907_v58 }
 0xdb6   :  { %2850 = vmatprep.subr.bf16.mxu0 %v3149_v0 }
 0xdb9   :  { %2851 = vmatpush3.bf16.msra.mxu0 %v2908_v13 }
 0xdba   :  { %2852 = vmatprep.subr.bf16.mxu0 %v3149_v0 }
 0xdbd   :  { %2853 = vmatpush3.bf16.msra.mxu0 %v2909_v60 }
 0xdbe   :  { %2854 = vmatprep.subr.bf16.mxu0 %v3149_v0  ;;  %v2475_v0 = vld [vmem:[%s3788_s10] ss:$0 sm:$0xff] }
 0xdc1   :  { %2855 = vmatpush3.bf16.msra.mxu0 %v2910_v1 }
 0xde2   :  { %v2168_v37 = vpop.xlane.xlu0 %2167 }
 0xde6   :  { %v614_v36 = vpop.xlane.xlu0 %613 }
 0xde7   :  { %2967 = vrcp.f32 %v614_v36 }
 0xdf1   :  { %v2968_v28 = vpop.eup %2967 }
 0xdf2   :  { %v708_v38 = vmul.f32 %v2968_v28, %v3416_v35 }
 0xdf8   :  { %v2171_v44 = vpop.xlane.xlu1 %2170 }
 0xdfc   :  { %v617_v29 = vpop.xlane.xlu1 %616 }
 0xdfd   :  { %2969 = vrcp.f32 %v617_v29 }
 0xdfe   :  { %2971 = vrcp.f32 %v2168_v37 }
 0xdff   :  { %2973 = vrcp.f32 %v2171_v44 }
 0xe07   :  { %v2970_v51 = vpop.eup %2969 }
 0xe08   :  { %v709_v40 = vmul.f32 %v2970_v51, %v3418_v39  ;;  %v2972_v2 = vpop.eup %2971 }
 0xe09   :  { %v2974_v4 = vpop.eup %2973 }
 0xe0a   :  { %v710_v45 = vpack.c.bf16 %v709_v40, %v708_v38 }
 0xe0c   :  { %711 = vst.msk [vmem:[#allocation2] sm:$0xff] %vm507_vm1, %v710_v45 }
 0xe11   :  { %v935_v41 = vpop.permute.xlu0 %934 }
 0xe12   :  { %938 = vst.msk [vmem:[#allocation2] sm:$0xff] %vm937_vm2, %v935_v41 }
 0xe15   :  { %v1158_v42 = vpop.permute.xlu1 %1157 }
 0xe16   :  { %1161 = vst.msk [vmem:[#allocation2] sm:$0xff] %vm1160_vm3, %v1158_v42 }
 0xe19   :  { %v1381_v43 = vpop.permute.xlu1 %1380 }
 0xe1a   :  { %1384 = vst.msk [vmem:[#allocation2] sm:$0xff] %vm1383_vm4, %v1381_v43 }
 0xe1d   :  { %v1604_v24 = vpop.permute.xlu0 %1603 }
 0xe1e   :  { %1607 = vst.msk [vmem:[#allocation2] sm:$0xff] %vm1606_vm5, %v1604_v24 }
 0xe21   :  { %v1827_v50 = vpop.permute.xlu1 %1826 }
 0xe22   :  { %1830 = vst.msk [vmem:[#allocation2] sm:$0xff] %vm1829_vm6, %v1827_v50 }
 0xe25   :  { %v2050_v35 = vpop.permute.xlu0 %2049 }
 0xe26   :  { %2053 = vst.msk [vmem:[#allocation2] sm:$0xff] %vm2052_vm7, %v2050_v35 }
 0xe35   :  { %v2214_v39 = vpop.f32.mrb[52].mxu0 }
 0xe36   :  { %v2832_v54 = vpop.f32.mrb[53].mxu0  ;;  %v2268_v8 = vmul.f32 %v2972_v2, %v2214_v39 }
 0xe37   :  { %v2217_v59 = vpop.f32.mrb[54].mxu0 }
 0xe38   :  { %v2833_v61 = vpop.f32.mrb[55].mxu0 }
 0xe3f   :  { %v2260_v6 = vpop.f32.mrb[80].mxu1 }
 0xe40   :  { %v2269_v11 = vmul.f32 %v2974_v4, %v2260_v6  ;;  %v2838_v26 = vpop.f32.mrb[81].mxu1 }
 0xe41   :  { %v2263_v14 = vpop.f32.mrb[82].mxu1 }
 0xe42   :  { %v2270_v18 = vpack.c.bf16 %v2269_v11, %v2268_v8  ;;  %v2839_v19 = vpop.f32.mrb[83].mxu1 }
 0xe44   :  { %2272 = vrot.lane.b32.xlu1 %v2270_v18, %s3151_s4 }
 0xeb6   :  { %v2273_v20 = vpop.permute.xlu1 %2272 }
 0xeb7   :  { %2276 = vst.msk [vmem:[#allocation2] sm:$0xff] %vm2275_vm8, %v2273_v20 }
 0xebe   :  { %v2277_v21 = vld [vmem:[#allocation2] sm:$0xff] }
 0xebf   :  { %2857 = vmatmul.mubr.bf16.vlgmr.msra.gmra.mrb[56].mxu0 %v2277_v21 }
 0xf92   :  { %v2383_v22 = vpop.f32.mrb[56].mxu0 }
 0xf93   :  { %v2384_v23 = vadd.f32 %v2475_v0, %v2383_v22  ;;  %v2858_v56 = vpop.f32.mrb[57].mxu0 }
 0xf94   :  { %v2386_v27 = vpop.f32.mrb[58].mxu0 }
 0xf95   :  { %2390 = vst [vmem:[#allocation14] sm:$0xff] %v2384_v23  ;;  %v2387_v31 = vadd.f32 %v2475_v0, %v2386_v27  ;;  %v2859_v32 = vpop.f32.mrb[59].mxu0 }
 0xf97   :  { %2391 = vst [vmem:[#allocation14 + $0x8] sm:$0xff] %v2387_v31 }
 0xf98   :  { %3118 = shalt.err (!%p3115_p10)
}
 0xf99   :  { %s3119_s17 = scalar_lea.hbm %s3789_s11, 256 }
 0xf9a   :  { %p3120_p11 = scmp.ne.s32.totalorder %s3789_s11, %s3119_s17  ;;  %p3123_p12 = scmp.lt.u32.totalorder %s3119_s17, %s3789_s11 }
 0xf9c   :  { %p3125_p13 = pnand %p3123_p12, %p3120_p11 }
 0xf9e   :  { %3128 = shalt.err (!%p3125_p13)
}
 0xf9f   :  { %2403 = dma.vmem_to_hbm [thread:$0]  %s2398_s16, 256, %s3789_s11, [#allocation5], %s3140_s27, %s3140_s27, %s3141_s28  }
 0xfa0   :  { %3137 = dma.done.wait [#allocation5], 256  }
 0xfa1   :  { %3138 = vsyncadd [#allocation5], 4294967040 }
 0xfa2   :  { %2407 = vsyncpa [#allocation4], 1 }
 0xfa3   :  { %2408 = vsyncpa [#allocation7], 1 }
 0xfa4   :  { %2409 = vsyncpa [#allocation10], 1 }
 0xfa5   :  { %2410 = vsyncpa [#allocation13], 1 }
 0xfa6   :  { %2411 = vsyncpa [#allocation5], 1 }

</bundles_post_ra>
